<compile_context>
chip_gen: v7x
topology: tpu7x:2x2x1
jax: 0.10.0
libtpu: 0.0.40
codegen_flags: <defaults>
</compile_context>

<pallas_src>
import functools

import jax
import jax.numpy as jnp
from jax.experimental import pallas as pl
from jax.experimental.pallas import tpu as pltpu


def cgconv_block_kernel(dst_ref, fpre_ref, spre_ref, x_ref, w1_ref, b1_ref,
                        o_ref, agg_sc):
    n_nodes, _ = x_ref.shape
    tile_e = fpre_ref.shape[0]
    step = pl.program_id(0)
    last = pl.num_programs(0) - 1

    @pl.when(step == 0)
    def _init():
        agg_sc[...] = jnp.zeros_like(agg_sc)

    # Gate activation (f32 elementwise; EUP for exp / reciprocal).
    f_pre = fpre_ref[...].astype(jnp.float32)                     # [TE, F]
    s_pre = spre_ref[...].astype(jnp.float32)                     # [TE, F]
    sig = pl.reciprocal(1.0 + jnp.exp(-f_pre), approx=True)
    sp = jnp.maximum(s_pre, 0.0) + jnp.log1p(jnp.exp(-jnp.abs(s_pre)))
    msg = (sig * sp).astype(jnp.bfloat16)                         # [TE, F]

    # Scatter-add onto destination nodes as a one-hot MXU matmul.
    # Padded edges carry dst == n_nodes -> no match -> all-zero column.
    node_iota = jax.lax.broadcasted_iota(jnp.int32, (n_nodes, tile_e), 0)
    scatter = (node_iota == dst_ref[...]).astype(jnp.bfloat16)    # [N, TE]
    agg_sc[...] += jnp.dot(scatter, msg, preferred_element_type=jnp.float32)

    @pl.when(step == last)
    def _finalize():
        h = x_ref[...] + agg_sc[...]                              # CGConv residual
        out = jnp.dot(h.astype(jnp.bfloat16), w1_ref[...],
                      preferred_element_type=jnp.float32) + b1_ref[...]
        o_ref[...] = jnp.maximum(out, 0.0)                        # Linear + ReLU


@functools.partial(jax.jit, static_argnames=("edge_tile",))
def cgconv_block(x, edge_index, edge_attr, params, *, edge_tile=256):
    """x: [N, F] f32, edge_index: [2, E] int32 (row0 = src j, row1 = dst i),
    edge_attr: [E, D] f32."""
    n, f = x.shape
    e = edge_index.shape[1]
    d = edge_attr.shape[1]

    # --- XLA-side preprocessing (dense projections + per-edge row gathers). ---
    # Fused gate weights, split by z-segments  z = [x_i | x_j | edge_attr].
    w_fs = jnp.concatenate([params["wf"], params["ws"]], axis=1)   # [2F+D, 2F]
    b_fs = jnp.concatenate([params["bf"], params["bs"]], axis=1)   # [1, 2F]
    px = x @ w_fs[:f]                                              # [N, 2F] (x_i term)
    qx = x @ w_fs[f:2 * f]                                         # [N, 2F] (x_j term)
    src = edge_index[0].astype(jnp.int32)
    dst = edge_index[1].astype(jnp.int32)
    gate_pre = px[dst] + qx[src] + edge_attr @ w_fs[2 * f:] + b_fs  # [E, 2F] f32
    f_pre = gate_pre[:, :f].astype(jnp.bfloat16)                   # sigmoid half
    s_pre = gate_pre[:, f:].astype(jnp.bfloat16)                   # softplus half

    w1 = params["w1"].astype(jnp.bfloat16)                         # [F, F]
    b1 = params["b1"]                                              # [1, F] f32

    # Pad edges to a multiple of the tile; padded edges target node `n`
    # (out of range) so their one-hot scatter column is all zero.
    e_pad = int(pl.cdiv(e, edge_tile)) * edge_tile
    pad = e_pad - e
    dst_row = jnp.pad(dst, (0, pad), constant_values=n).reshape(1, e_pad)
    f_pre = jnp.pad(f_pre, ((0, pad), (0, 0)))
    s_pre = jnp.pad(s_pre, ((0, pad), (0, 0)))
    n_tiles = e_pad // edge_tile

    resident = lambda shape: pl.BlockSpec(shape, lambda i: (0, 0))

    cost = pl.CostEstimate(
        flops=int(2 * n * e_pad * f + 2 * n * f * f),
        transcendentals=int(4 * e_pad * f),
        bytes_accessed=int(4 * e_pad + 2 * (2 * e_pad * f) + 4 * n * f
                           + 2 * f * f + 4 * f + 4 * n * f),
    )

    out = pl.pallas_call(
        cgconv_block_kernel,
        out_shape=jax.ShapeDtypeStruct((n, f), jnp.float32),
        grid_spec=pltpu.PrefetchScalarGridSpec(
            num_scalar_prefetch=0,
            grid=(n_tiles,),
            in_specs=[
                pl.BlockSpec((1, edge_tile), lambda i: (0, i)),    # dst indices
                pl.BlockSpec((edge_tile, f), lambda i: (i, 0)),    # sigmoid pre-act
                pl.BlockSpec((edge_tile, f), lambda i: (i, 0)),    # softplus pre-act
                resident((n, f)),                                  # x (residual)
                resident((f, f)),                                  # W1 (MLP)
                resident((1, f)),                                  # b1
            ],
            out_specs=pl.BlockSpec((n, f), lambda i: (0, 0)),
            scratch_shapes=[
                pltpu.VMEM((n, f), jnp.float32),                   # scatter accumulator
            ]),
        compiler_params=pltpu.CompilerParams(
            dimension_semantics=("arbitrary",),
            vmem_limit_bytes=32 * 1024 * 1024),
        cost_estimate=cost,
    )(dst_row, f_pre, s_pre, x, w1, b1)
    return out


def cgconv_block_ref(x, edge_index, edge_attr, params):
    """Pure-JAX f32 reference (PyG CGConv aggr='add' + Linear + ReLU)."""
    src, dst = edge_index[0], edge_index[1]
    z = jnp.concatenate([x[dst], x[src], edge_attr], axis=-1)
    fg = jax.nn.sigmoid(z @ params["wf"] + params["bf"])
    sg = jax.nn.softplus(z @ params["ws"] + params["bs"])
    msg = fg * sg
    agg = jnp.zeros_like(x).at[dst].add(msg)
    h = x + agg
    return jnp.maximum(h @ params["w1"] + params["b1"], 0.0)


def init_params(key, input_channels, num_edge_features):
    f = input_channels
    zd = 2 * f + num_edge_features
    ks = jax.random.split(key, 6)
    scale_z = 1.0 / jnp.sqrt(zd)
    scale_f = 1.0 / jnp.sqrt(f)
    return {
        "wf": jax.random.uniform(ks[0], (zd, f), jnp.float32, -scale_z, scale_z),
        "bf": jax.random.uniform(ks[1], (1, f), jnp.float32, -scale_z, scale_z),
        "ws": jax.random.uniform(ks[2], (zd, f), jnp.float32, -scale_z, scale_z),
        "bs": jax.random.uniform(ks[3], (1, f), jnp.float32, -scale_z, scale_z),
        "w1": jax.random.uniform(ks[4], (f, f), jnp.float32, -scale_f, scale_f),
        "b1": jax.random.uniform(ks[5], (1, f), jnp.float32, -scale_f, scale_f),
    }


if __name__ == "__main__":
    key = jax.random.PRNGKey(0)
    k_x, k_ei, k_ea, k_p = jax.random.split(key, 4)

    N = 16     # nodes
    F = 32     # input_channels
    D = 8      # num_edge_features
    E = 600    # edges -> pads to 3 tiles of 256, exercising the accumulator path

    x = jax.random.normal(k_x, (N, F), jnp.float32)
    edge_index = jax.random.randint(k_ei, (2, E), 0, N, jnp.int32)
    edge_attr = jax.random.normal(k_ea, (E, D), jnp.float32)
    params = init_params(k_p, F, D)

    out = jax.block_until_ready(cgconv_block(x, edge_index, edge_attr, params))
    ref = jax.block_until_ready(cgconv_block_ref(x, edge_index, edge_attr, params))

    assert out.shape == (N, F) and out.dtype == jnp.float32
    max_err = float(jnp.max(jnp.abs(out - ref)))
    tol = 0.05 * float(jnp.max(jnp.abs(ref))) + 0.05   # bf16-MXU rounding budget
    assert max_err < tol, f"max abs err {max_err} (tol {tol})"
    print("KERNEL_OK")
</pallas_src>

<mosaic_0001>
module attributes {stable_mosaic.version = 11 : i64} {
  func.func @cgconv_block_kernel(%arg0: i32, %arg1: memref<1x256xi32, #tpu.memory_space<vmem>>, %arg2: memref<256x32xbf16, #tpu.memory_space<vmem>>, %arg3: memref<256x32xbf16, #tpu.memory_space<vmem>>, %arg4: memref<16x32xf32, #tpu.memory_space<vmem>>, %arg5: memref<32x32xbf16, #tpu.memory_space<vmem>>, %arg6: memref<1x32xf32, #tpu.memory_space<vmem>>, %arg7: memref<16x32xf32, #tpu.memory_space<vmem>>, %arg8: memref<16x32xf32, #tpu.memory_space<vmem>>) attributes {dimension_semantics = [#tpu.dimension_semantics<arbitrary>], iteration_bounds = array<i64: 3>, scalar_prefetch = 0 : i64, scratch_operands = 1 : i64, tpu.core_type = #tpu.core_type<tc>, window_params = [{transform_indices = @transform_0, window_bounds = array<i64: 1, 256>}, {transform_indices = @transform_1, window_bounds = array<i64: 256, 32>}, {transform_indices = @transform_2, window_bounds = array<i64: 256, 32>}, {pipeline_mode = #tpu.pipeline_mode<synchronous>, transform_indices = @transform_3, window_bounds = array<i64: 16, 32>}, {pipeline_mode = #tpu.pipeline_mode<synchronous>, transform_indices = @transform_4, window_bounds = array<i64: 32, 32>}, {pipeline_mode = #tpu.pipeline_mode<synchronous>, transform_indices = @transform_5, window_bounds = array<i64: 1, 32>}, {pipeline_mode = #tpu.pipeline_mode<synchronous>, transform_indices = @transform_6, window_bounds = array<i64: 16, 32>}]} {
    %c0_i32 = arith.constant 0 : i32
    %0 = arith.cmpi eq, %arg0, %c0_i32 : i32
    %1 = arith.extui %0 : i1 to i32
    %c0_i32_0 = arith.constant 0 : i32
    %2 = arith.cmpi ne, %1, %c0_i32_0 : i32
    scf.if %2 {
      %cst_15 = arith.constant 0.000000e+00 : f32
      %37 = vector.broadcast %cst_15 : f32 to vector<16x32xf32>
      %c0_16 = arith.constant 0 : index
      %c0_17 = arith.constant 0 : index
      %38 = vector.load %arg8[%c0_16, %c0_17] : memref<16x32xf32, #tpu.memory_space<vmem>>, vector<16x32xf32>
      tpu.vector_store %arg8[%c0_16, %c0_17], %37 {strides = array<i32>} : memref<16x32xf32, #tpu.memory_space<vmem>>, vector<16x32xf32>,
    } else {
    }
    %c0 = arith.constant 0 : index
    %c0_1 = arith.constant 0 : index
    %3 = vector.load %arg2[%c0, %c0_1] : memref<256x32xbf16, #tpu.memory_space<vmem>>, vector<256x32xbf16>
    %4 = arith.extf %3 : vector<256x32xbf16> to vector<256x32xf32>
    %c0_2 = arith.constant 0 : index
    %c0_3 = arith.constant 0 : index
    %5 = vector.load %arg3[%c0_2, %c0_3] : memref<256x32xbf16, #tpu.memory_space<vmem>>, vector<256x32xbf16>
    %6 = arith.extf %5 : vector<256x32xbf16> to vector<256x32xf32>
    %cst = arith.constant 0.000000e+00 : f32
    %7 = vector.broadcast %cst : f32 to vector<256x32xf32>
    %8 = arith.subf %7, %4 : vector<256x32xf32>
    %9 = math.exp %8 : vector<256x32xf32>
    %cst_4 = arith.constant 1.000000e+00 : f32
    %10 = vector.broadcast %cst_4 : f32 to vector<256x32xf32>
    %11 = arith.addf %10, %9 : vector<256x32xf32>
    %12 = tpu.reciprocal %11 {approx = true} : vector<256x32xf32> -> vector<256x32xf32>
    %cst_5 = arith.constant 0.000000e+00 : f32
    %13 = vector.broadcast %cst_5 : f32 to vector<256x32xf32>
    %14 = arith.maximumf %6, %13 : vector<256x32xf32>
    %15 = math.absf %6 : vector<256x32xf32>
    %cst_6 = arith.constant 0.000000e+00 : f32
    %16 = vector.broadcast %cst_6 : f32 to vector<256x32xf32>
    %17 = arith.subf %16, %15 : vector<256x32xf32>
    %18 = math.exp %17 : vector<256x32xf32>
    %19 = math.log1p %18 : vector<256x32xf32>
    %20 = arith.addf %14, %19 : vector<256x32xf32>
    %21 = arith.mulf %12, %20 : vector<256x32xf32>
    %22 = arith.truncf %21 : vector<256x32xf32> to vector<256x32xbf16>
    %23 = tpu.iota {dimensions = array<i32: 0>} : vector<16x256xi32>
    %c0_7 = arith.constant 0 : index
    %c0_8 = arith.constant 0 : index
    %24 = vector.load %arg1[%c0_7, %c0_8] : memref<1x256xi32, #tpu.memory_space<vmem>>, vector<1x256xi32>
    %25 = vector.broadcast %24 : vector<1x256xi32> to vector<16x256xi32>
    %26 = arith.cmpi eq, %23, %25 : vector<16x256xi32>
    %27 = arith.extui %26 : vector<16x256xi1> to vector<16x256xi32>
    %28 = arith.sitofp %27 : vector<16x256xi32> to vector<16x256xf32>
    %29 = arith.truncf %28 : vector<16x256xf32> to vector<16x256xbf16>
    %c0_9 = arith.constant 0 : index
    %c0_10 = arith.constant 0 : index
    %30 = vector.load %arg8[%c0_9, %c0_10] : memref<16x32xf32, #tpu.memory_space<vmem>>, vector<16x32xf32>
    %cst_11 = arith.constant dense<0.000000e+00> : vector<16x32xf32>
    %31 = tpu.matmul %29, %22, %cst_11 {dimension_numbers = #tpu.dot_dimension_numbers<[1], [0], [0], [1], [0, 0, 1, 1], [], []>} : vector<16x256xbf16>, vector<256x32xbf16>, vector<16x32xf32> -> vector<16x32xf32>
    %32 = arith.addf %30, %31 : vector<16x32xf32>
    %c0_12 = arith.constant 0 : index
    %c0_13 = arith.constant 0 : index
    %33 = vector.load %arg8[%c0_12, %c0_13] : memref<16x32xf32, #tpu.memory_space<vmem>>, vector<16x32xf32>
    tpu.vector_store %arg8[%c0_12, %c0_13], %32 {strides = array<i32>} : memref<16x32xf32, #tpu.memory_space<vmem>>, vector<16x32xf32>,
    %c2_i32 = arith.constant 2 : i32
    %34 = arith.cmpi eq, %arg0, %c2_i32 : i32
    %35 = arith.extui %34 : i1 to i32
    %c0_i32_14 = arith.constant 0 : i32
    %36 = arith.cmpi ne, %35, %c0_i32_14 : i32
    scf.if %36 {
      %c0_15 = arith.constant 0 : index
      %c0_16 = arith.constant 0 : index
      %37 = vector.load %arg4[%c0_15, %c0_16] : memref<16x32xf32, #tpu.memory_space<vmem>>, vector<16x32xf32>
      %c0_17 = arith.constant 0 : index
      %c0_18 = arith.constant 0 : index
      %38 = vector.load %arg8[%c0_17, %c0_18] : memref<16x32xf32, #tpu.memory_space<vmem>>, vector<16x32xf32>
      %39 = arith.addf %37, %38 : vector<16x32xf32>
      %40 = arith.truncf %39 : vector<16x32xf32> to vector<16x32xbf16>
      %c0_19 = arith.constant 0 : index
      %c0_20 = arith.constant 0 : index
      %41 = vector.load %arg5[%c0_19, %c0_20] : memref<32x32xbf16, #tpu.memory_space<vmem>>, vector<32x32xbf16>
      %cst_21 = arith.constant dense<0.000000e+00> : vector<16x32xf32>
      %42 = tpu.matmul %40, %41, %cst_21 {dimension_numbers = #tpu.dot_dimension_numbers<[1], [0], [0], [1], [0, 0, 1, 1], [], []>} : vector<16x32xbf16>, vector<32x32xbf16>, vector<16x32xf32> -> vector<16x32xf32>
      %c0_22 = arith.constant 0 : index
      %c0_23 = arith.constant 0 : index
      %43 = vector.load %arg6[%c0_22, %c0_23] : memref<1x32xf32, #tpu.memory_space<vmem>>, vector<1x32xf32>
      %44 = vector.broadcast %43 : vector<1x32xf32> to vector<16x32xf32>
      %45 = arith.addf %42, %44 : vector<16x32xf32>
      %cst_24 = arith.constant 0.000000e+00 : f32
      %46 = vector.broadcast %cst_24 : f32 to vector<16x32xf32>
      %47 = arith.maximumf %45, %46 : vector<16x32xf32>
      %c0_25 = arith.constant 0 : index
      %c0_26 = arith.constant 0 : index
      %48 = vector.load %arg7[%c0_25, %c0_26] : memref<16x32xf32, #tpu.memory_space<vmem>>, vector<16x32xf32>
      tpu.vector_store %arg7[%c0_25, %c0_26], %47 {strides = array<i32>} : memref<16x32xf32, #tpu.memory_space<vmem>>, vector<16x32xf32>,
    } else {
    }
    return
  }
  func.func @transform_0(%arg0: i32) -> (i32, i32) {
    %c0_i32 = arith.constant 0 : i32
    %c0_i32_0 = arith.constant 0 : i32
    return %c0_i32, %arg0 : i32, i32
  }
  func.func @transform_1(%arg0: i32) -> (i32, i32) {
    %c0_i32 = arith.constant 0 : i32
    %c0_i32_0 = arith.constant 0 : i32
    return %arg0, %c0_i32 : i32, i32
  }
  func.func @transform_2(%arg0: i32) -> (i32, i32) {
    %c0_i32 = arith.constant 0 : i32
    %c0_i32_0 = arith.constant 0 : i32
    return %arg0, %c0_i32 : i32, i32
  }
  func.func @transform_3(%arg0: i32) -> (i32, i32) {
    %c0_i32 = arith.constant 0 : i32
    %c0_i32_0 = arith.constant 0 : i32
    %c0_i32_1 = arith.constant 0 : i32
    return %c0_i32, %c0_i32_0 : i32, i32
  }
  func.func @transform_4(%arg0: i32) -> (i32, i32) {
    %c0_i32 = arith.constant 0 : i32
    %c0_i32_0 = arith.constant 0 : i32
    %c0_i32_1 = arith.constant 0 : i32
    return %c0_i32, %c0_i32_0 : i32, i32
  }
  func.func @transform_5(%arg0: i32) -> (i32, i32) {
    %c0_i32 = arith.constant 0 : i32
    %c0_i32_0 = arith.constant 0 : i32
    %c0_i32_1 = arith.constant 0 : i32
    return %c0_i32, %c0_i32_0 : i32, i32
  }
  func.func @transform_6(%arg0: i32) -> (i32, i32) {
    %c0_i32 = arith.constant 0 : i32
    %c0_i32_0 = arith.constant 0 : i32
    %c0_i32_1 = arith.constant 0 : i32
    return %c0_i32, %c0_i32_0 : i32, i32
  }
}

</mosaic_0001>

<bundles_post_ra>
// kernel: cgconv_block.1
= control target key start
LH: loop header
LB: loop body
LE: loop exit
PB: predicated region body
PF: predicated region fallthrough
CT: control target
= control target key end

     0   :  { %11 = vsyncpa [#allocation4], 0  ;;  %s1907_s21 = smov 0   ;;  %s2454_s0 = inlined_call_operand.vmem [shape: s32[1,768], index: 0, kind: input, shape index: {}]   ;;  %s2455_s1 = inlined_call_operand.vmem [shape: bf16[768,32], index: 1, kind: input, shape index: {}]   ;;  %s2456_s2 = inlined_call_operand.vmem [shape: bf16[768,32], index: 2, kind: input, shape index: {}]   ;;  %s2457_s3 = inlined_call_operand.vmem [shape: f32[16,32], index: 3, kind: input, shape index: {}]   ;;  %s2458_s4 = inlined_call_operand.vmem [shape: bf16[32,32], index: 4, kind: input, shape index: {}]   ;;  %s2459_s5 = inlined_call_operand.vmem [shape: f32[1,32], index: 5, kind: input, shape index: {}]   ;;  %s2460_s6 = inlined_call_operand.hbm [shape: f32[16,32], index: 6, kind: output, shape index: {}]  }
   0x1 LB: > { %s1913_s22 = sadd.s32 4294967295, %s1863_s21   ;;  %p1333_p0 = scmp.ge.s32.totalorder %s1863_s21, 1  ;;  %s1863_s21 = sphi %s1907_s21, %s17_s21  }
   0x2   : > { %p230_p1 = scmp.lt.s32.totalorder %s1863_s21, 4 }
   0x4   : > { %p231_p2 = pnand %p1333_p0, %p230_p1 }
   0x5   : > { %s1334_s23 = sshll.u32 (!%p231_p2), %s1913_s22, 1  ;;  %s1335_s24 = sshll.u32 (!%p231_p2), %s1913_s22, 5 }
   0x6   : > { %234 = sbr.rel (%p231_p2) target bundleno = 712 (0x2c8), region = 44  ;;  %p265_p3 = scmp.lt.s32.totalorder (!%p231_p2), %s1334_s23, 5 }
   0x7   : > { %p270_p4 = scmp.lt.s32.totalorder (!%p231_p2), %s1335_s24, 95  ;;  %p1339_p5 = scmp.ne.s32.totalorder (!%p231_p2), %s1913_s22, 0 }
   0xd   : > { %s2518_s23 = smov (!%p265_p3, %s1334_s23), 5  ;;  %s2520_s24 = smov (!%p270_p4, %s1335_s24), 95 }
   0xe   : > { %s267_s27 = scalar_lea.vmem %s2454_s0, %s2518_s23  ;;  %s1336_s28 = sshll.u32 %s2520_s24, 2  ;;  %vm286_vm0 = vcmask (!%p1339_p5), 261120   ;;  %v1865_v0 = vmov (!%p1339_p5), 0.0  }
   0xf   : > { %s1928_s7 = scalar_lea.vmem %s2455_s1, %s1336_s28  ;;  %s1933_s10 = scalar_lea.vmem %s2456_s2, %s1336_s28  ;;  %287 = vst.msk [vmem:[#allocation2] sm:$0xff] (!%p1339_p5), %vm286_vm0, %v1865_v0  ;;  %288 = vst.msk [vmem:[#allocation2 + $0x8] sm:$0xff] (!%p1339_p5), %vm286_vm0, %v1865_v0 }
  0x10   : > { %285 = sbr.rel (%p1339_p5) target bundleno = 23 (0x17), region = 48 }
  0x17 PF: > { %v1492_v1 = vld [vmem:[%s1928_s7 + $0x40] sm:$0xff]   ;;  %v1493_v15 = vld [vmem:[%s1928_s7 + $0x48] sm:$0xff]   ;;  %v1953_v60 = vld [vmem:[%s1928_s7 + $0x50] sm:$0xff]   ;;  %p1348_p6 = scmp.ne.s32.totalorder %s1913_s22, 2 }
  0x18   : > { %v1507_v2 = vld [vmem:[%s1933_s10 + $0x40] sm:$0xff]   ;;  %v1391_v4 = vunpack.c.l.bf16 %v1492_v1  ;;  %v1392_v5 = vunpack.c.h.bf16 %v1492_v1  ;;  %v1508_v22 = vld [vmem:[%s1933_s10 + $0x48] sm:$0xff]   ;;  %v1395_v29 = vunpack.c.l.bf16 %v1493_v15  ;;  %v1396_v32 = vunpack.c.h.bf16 %v1493_v15 }
  0x19   : > { %v1358_v3 = vld [vmem:[%s1928_s7] sm:$0xff]   ;;  %v1455_v6 = vunpack.c.l.bf16 %v1507_v2  ;;  %v1456_v7 = vunpack.c.h.bf16 %v1507_v2  ;;  %v1459_v35 = vunpack.c.l.bf16 %v1508_v22  ;;  %v1460_v36 = vunpack.c.h.bf16 %v1508_v22  ;;  %v1485_v39 = vld [vmem:[%s1928_s7 + $0x8] sm:$0xff]  }
  0x1a   : > { %v1422_v8 = vld [vmem:[%s1933_s10] sm:$0xff]   ;;  %v1359_v9 = vunpack.c.l.bf16 %v1358_v3  ;;  %v1360_v10 = vunpack.c.h.bf16 %v1358_v3  ;;  %v433_v11 = vsub.f32 0.0, %v1391_v4  ;;  %v434_v12 = vsub.f32 0.0, %v1392_v5  ;;  %v1500_v48 = vld [vmem:[%s1933_s10 + $0x8] sm:$0xff]  }
  0x1b   : > { %v1423_v13 = vunpack.c.l.bf16 %v1422_v8  ;;  %v1424_v14 = vunpack.c.h.bf16 %v1422_v8  ;;  %v625_v16 = vand.u32 2147483647, %v1455_v6  ;;  %v626_v17 = vand.u32 2147483647, %v1456_v7 }
  0x1c   : > { %v417_v18 = vsub.f32 0.0, %v1359_v9  ;;  %v418_v19 = vsub.f32 0.0, %v1360_v10  ;;  %v481_v20 = vmul.f32 1.442695, %v433_v11  ;;  %v483_v21 = vmul.f32 1.442695, %v434_v12 }
  0x1d   : > { %v657_v23 = vsub.f32 0.0, %v625_v16  ;;  %v658_v24 = vsub.f32 0.0, %v626_v17  ;;  %v609_v27 = vand.u32 2147483647, %v1423_v13  ;;  %v610_v28 = vand.u32 2147483647, %v1424_v14 }
  0x1e   : > { %v449_v25 = vmul.f32 1.442695, %v417_v18  ;;  %v451_v26 = vmul.f32 1.442695, %v418_v19  ;;  %1569 = vpow2.f32 %v481_v20  ;;  %v435_v37 = vsub.f32 0.0, %v1395_v29 }
  0x1f   : > { %1571 = vpow2.f32 %v483_v21  ;;  %v705_v30 = vmul.f32 1.442695, %v657_v23  ;;  %v707_v31 = vmul.f32 1.442695, %v658_v24  ;;  %v641_v33 = vsub.f32 0.0, %v609_v27 }
  0x20   : > { %1573 = vpow2.f32 %v449_v25  ;;  %v642_v34 = vsub.f32 0.0, %v610_v28  ;;  %v436_v38 = vsub.f32 0.0, %v1396_v32  ;;  %v485_v42 = vmul.f32 1.442695, %v435_v37 }
  0x21   : > { %1575 = vpow2.f32 %v705_v30  ;;  %v673_v40 = vmul.f32 1.442695, %v641_v33  ;;  %v627_v43 = vand.u32 2147483647, %v1459_v35  ;;  %v628_v44 = vand.u32 2147483647, %v1460_v36 }
  0x22   : > { %1577 = vpow2.f32 %v707_v31  ;;  %v675_v41 = vmul.f32 1.442695, %v642_v34  ;;  %v1363_v45 = vunpack.c.l.bf16 %v1485_v39  ;;  %v487_v46 = vmul.f32 1.442695, %v436_v38 }
  0x23   : > { %1579 = vpow2.f32 %v451_v26  ;;  %v1364_v47 = vunpack.c.h.bf16 %v1485_v39  ;;  %v1944_v49 = vmax.f32 %v1455_v6, 0.0  ;;  %v659_v50 = vsub.f32 0.0, %v627_v43 }
  0x24   : > { %1581 = vpow2.f32 %v673_v40  ;;  %v1946_v51 = vmax.f32 %v1456_v7, 0.0  ;;  %v1948_v52 = vmax.f32 %v1423_v13, 0.0  ;;  %v660_v53 = vsub.f32 0.0, %v628_v44 }
  0x25   : > { %1583 = vpow2.f32 %v675_v41  ;;  %v419_v54 = vsub.f32 0.0, %v1363_v45  ;;  %v1950_v56 = vmax.f32 %v1424_v14, 0.0  ;;  %v709_v57 = vmul.f32 1.442695, %v659_v50  ;;  %v1967_v14 = vld [vmem:[%s1933_s10 + $0x50] sm:$0xff]  }
  0x26   : > { %1585 = vpow2.f32 %v485_v42  ;;  %v1427_v58 = vunpack.c.l.bf16 %v1500_v48  ;;  %v420_v59 = vsub.f32 0.0, %v1364_v47  ;;  %v1955_v63 = vmax.f32 %v1459_v35, 0.0 }
  0x27   : > { %1587 = vpow2.f32 %v487_v46  ;;  %v1428_v0 = vunpack.c.h.bf16 %v1500_v48  ;;  %v1957_v3 = vmax.f32 %v1460_v36, 0.0  ;;  %v711_v6 = vmul.f32 1.442695, %v660_v53 }
  0x28   : > { %v1570_v55 = vpop.eup %1569  ;;  %1589 = vpow2.f32 %v709_v57  ;;  %v1959_v4 = vmax.f32 %v1427_v58, 0.0  ;;  %v1961_v7 = vmul.f32 1.442695, %v419_v54  ;;  %v1399_v9 = vunpack.c.l.bf16 %v1953_v60 }
  0x29   : > { %v1572_v61 = vpop.eup %1571  ;;  %v529_v62 = vadd.f32 1.0, %v1570_v55  ;;  %v1963_v8 = vmax.f32 %v1428_v0, 0.0  ;;  %v455_v13 = vmul.f32 1.442695, %v420_v59  ;;  %v611_v18 = vand.u32 2147483647, %v1427_v58 }
  0x2a   : > { %v1574_v1 = vpop.eup %1573  ;;  %v530_v2 = vadd.f32 1.0, %v1572_v61  ;;  %v612_v21 = vand.u32 2147483647, %v1428_v0  ;;  %v1400_v22 = vunpack.c.h.bf16 %v1953_v60  ;;  %v1463_v26 = vunpack.c.l.bf16 %v1967_v14 }
  0x2b   : > { %v1576_v5 = vpop.eup %1575  ;;  %1591 = vrcp.f32 %v529_v62  ;;  %v513_v20 = vadd.f32 1.0, %v1574_v1  ;;  %v643_v34 = vsub.f32 0.0, %v611_v18  ;;  %v1464_v37 = vunpack.c.h.bf16 %v1967_v14 }
  0x2c   : > { %v1578_v10 = vpop.eup %1577  ;;  %v881_v11 = vadd.f32 1.0, %v1576_v5  ;;  %v884_v12 = vmul.f32 -0.5, %v1576_v5  ;;  %1593 = vrcp.f32 %v530_v2  ;;  %v887_v24 = vand.u32 2147483647, %v1576_v5 }
  0x2d   : > { %v1580_v15 = vpop.eup %1579  ;;  %v890_v16 = vadd.f32 1.0, %v1578_v10  ;;  %v893_v17 = vmul.f32 -0.5, %v1578_v10  ;;  %v896_v29 = vand.u32 2147483647, %v1578_v10  ;;  %v644_v41 = vsub.f32 0.0, %v612_v21 }
  0x2e   : > { %v1582_v19 = vpop.eup %1581  ;;  %1595 = vlog2.f32 %v881_v11  ;;  %v885_v28 = vadd.f32 1.0, %v884_v12  ;;  %v514_v30 = vadd.f32 1.0, %v1580_v15  ;;  %vm1972_vm1 = vcmp.lt.f32.partialorder %v887_v24, 0.0004427343 }
  0x2f   : > { %v1584_v23 = vpop.eup %1583  ;;  %1597 = vlog2.f32 %v890_v16  ;;  %v737_v25 = vadd.f32 1.0, %v1582_v19  ;;  %v740_v31 = vmul.f32 -0.5, %v1582_v19  ;;  %v894_v32 = vadd.f32 1.0, %v893_v17 }
  0x30   : > { %v1586_v27 = vpop.eup %1585  ;;  %v746_v33 = vadd.f32 1.0, %v1584_v23  ;;  %v743_v35 = vand.u32 2147483647, %v1582_v19  ;;  %v749_v40 = vmul.f32 -0.5, %v1584_v23  ;;  %v886_v43 = vmul.f32 %v1576_v5, %v885_v28 }
  0x31   : > { %1599 = vlog2.f32 %v737_v25  ;;  %v531_v36 = vadd.f32 1.0, %v1586_v27  ;;  %v1588_v38 = vpop.eup %1587  ;;  %vm1976_vm2 = vcmp.lt.f32.partialorder %v896_v29, 0.0004427343  ;;  %v741_v45 = vadd.f32 1.0, %v740_v31 }
  0x32   : > { %1601 = vrcp.f32 %v513_v20  ;;  %v1590_v42 = vpop.eup %1589  ;;  %v895_v46 = vmul.f32 %v1578_v10, %v894_v32  ;;  %v752_v47 = vand.u32 2147483647, %v1584_v23  ;;  %vm1980_vm3 = vcmp.lt.f32.partialorder %v743_v35, 0.0004427343 }
  0x33   : > { %1603 = vlog2.f32 %v746_v33  ;;  %v899_v48 = vadd.f32 1.0, %v1590_v42  ;;  %v677_v54 = vmul.f32 1.442695, %v643_v34  ;;  %v437_v55 = vsub.f32 0.0, %v1399_v9 }
  0x34   : > { %1605 = vrcp.f32 %v514_v30  ;;  %v750_v58 = vadd.f32 1.0, %v749_v40  ;;  %v902_v59 = vmul.f32 -0.5, %v1590_v42  ;;  %v679_v60 = vmul.f32 1.442695, %v644_v41 }
  0x35   : > { %1607 = vrcp.f32 %v531_v36  ;;  %v1592_v50 = vpop.eup %1591  ;;  %v742_v62 = vmul.f32 %v1582_v19, %v741_v45  ;;  %v532_v0 = vadd.f32 1.0, %v1588_v38  ;;  %v438_v1 = vsub.f32 0.0, %v1400_v22 }
  0x36   : > { %1609 = vpow2.f32 %v711_v6  ;;  %v1594_v57 = vpop.eup %1593  ;;  %vm1985_vm4 = vcmp.lt.f32.partialorder %v752_v47, 0.0004427343  ;;  %v905_v6 = vand.u32 2147483647, %v1590_v42  ;;  %v489_v11 = vmul.f32 1.442695, %v437_v55 }
  0x37   : > { %1611 = vlog2.f32 %v899_v48  ;;  %v629_v12 = vand.u32 2147483647, %v1463_v26  ;;  %v751_v16 = vmul.f32 %v1584_v23, %v750_v58  ;;  %v903_v17 = vadd.f32 1.0, %v902_v59  ;;  %v1486_v23 = vld [vmem:[%s1928_s7 + $0x10] sm:$0xff]  }
  0x38   : > { %v1596_v61 = vpop.eup %1595  ;;  %1613 = vpow2.f32 %v1961_v7  ;;  %v491_v21 = vmul.f32 1.442695, %v438_v1  ;;  %vm1997_vm5 = vcmp.lt.f32.partialorder %v905_v6, 0.0004427343  ;;  %v630_v38 = vand.u32 2147483647, %v1464_v37 }
  0x39   : > { %v1598_v2 = vpop.eup %1597  ;;  %v883_v5 = vmul.f32 0.6931472, %v1596_v61  ;;  %1615 = vpow2.f32 %v455_v13  ;;  %v661_v27 = vsub.f32 0.0, %v629_v12  ;;  %v904_v34 = vmul.f32 %v1590_v42, %v903_v17  ;;  %v2021_v59 = vld [vmem:[%s1933_s10 + $0x10] sm:$0xff]  }
  0x3a   : > { %v892_v9 = vmul.f32 0.6931472, %v1598_v2  ;;  %1617 = vpow2.f32 %v677_v54  ;;  %v1367_v39 = vunpack.c.l.bf16 %v1486_v23  ;;  %v1368_v47 = vunpack.c.h.bf16 %v1486_v23 }
  0x3b   : > { %v1600_v15 = vpop.eup %1599  ;;  %v889_v7 = vsel %vm1972_vm1, %v886_v43, %v883_v5  ;;  %1619 = vpow2.f32 %v679_v60  ;;  %v2012_v53 = vmax.f32 %v1463_v26, 0.0  ;;  %v2016_v54 = vmax.f32 %v1464_v37, 0.0 }
  0x3c   : > { %v1602_v18 = vpop.eup %1601  ;;  %v898_v19 = vsel %vm1976_vm2, %v895_v46, %v892_v9  ;;  %v1041_v13 = vadd.f32 %v889_v7, %v1944_v49  ;;  %v739_v20 = vmul.f32 0.6931472, %v1600_v15  ;;  %1621 = vrcp.f32 %v532_v0 }
  0x3d   : > { %v1604_v22 = vpop.eup %1603  ;;  %v1042_v24 = vadd.f32 %v898_v19, %v1946_v51  ;;  %1623 = vpow2.f32 %v489_v11  ;;  %v713_v51 = vmul.f32 1.442695, %v661_v27  ;;  %v662_v58 = vsub.f32 0.0, %v630_v38  ;;  %v1495_v19 = vld [vmem:[%s1928_s7 + $0x58] sm:$0xff]  }
  0x3e   : > { %v1606_v28 = vpop.eup %1605  ;;  %v1073_v29 = vmul.f32 %v1592_v50, %v1041_v13  ;;  %v745_v30 = vsel %vm1980_vm3, %v742_v62, %v739_v20  ;;  %v748_v31 = vmul.f32 0.6931472, %v1604_v22  ;;  %1625 = vpow2.f32 %v491_v21 }
  0x3f   : > { %v1608_v49 = vpop.eup %1607  ;;  %v1074_v32 = vmul.f32 %v1594_v57, %v1042_v24  ;;  %v1025_v33 = vadd.f32 %v745_v30, %v1948_v52  ;;  %1627 = vpow2.f32 %v713_v51  ;;  %v421_v60 = vsub.f32 0.0, %v1367_v39 }
  0x40   : > { %v1610_v35 = vpop.eup %1609  ;;  %v754_v36 = vsel %vm1985_vm4, %v751_v16, %v748_v31  ;;  %v422_v37 = vsub.f32 0.0, %v1368_v47  ;;  %v1431_v11 = vunpack.c.l.bf16 %v2021_v59  ;;  %v715_v7 = vmul.f32 1.442695, %v662_v58 }
  0x41   : > { %v1612_v40 = vpop.eup %1611  ;;  %v1097_v41 = vpack.c.bf16 %v1074_v32, %v1073_v29  ;;  %v1026_v43 = vadd.f32 %v754_v36, %v1950_v56  ;;  %v1057_v44 = vmul.f32 %v1602_v18, %v1025_v33  ;;  %v908_v45 = vadd.f32 1.0, %v1610_v35 }
  0x42   : > { %v1614_v46 = vpop.eup %1613  ;;  %v901_v52 = vmul.f32 0.6931472, %v1612_v40  ;;  %v911_v42 = vmul.f32 -0.5, %v1610_v35  ;;  %v914_v1 = vand.u32 2147483647, %v1610_v35  ;;  %v1432_v16 = vunpack.c.h.bf16 %v2021_v59 }
  0x43   : > { %v1616_v48 = vpop.eup %1615  ;;  %1515 = vmatprep.subr.bf16.mxu0 %v1097_v41  ;;  %v1058_v50 = vmul.f32 %v1606_v28, %v1026_v43  ;;  %1629 = vlog2.f32 %v908_v45  ;;  %v515_v57 = vadd.f32 1.0, %v1614_v46  ;;  %v457_v18 = vmul.f32 1.442695, %v421_v60 }
  0x44   : > { %v1618_v56 = vpop.eup %1617  ;;  %v907_v55 = vsel %vm1997_vm5, %v904_v34, %v901_v52  ;;  %v912_v0 = vadd.f32 1.0, %v911_v42  ;;  %v516_v5 = vadd.f32 1.0, %v1616_v48  ;;  %vm2026_vm6 = vcmp.lt.f32.partialorder %v914_v1, 0.0004427343 }
  0x45   : > { %v1620_v61 = vpop.eup %1619  ;;  %v1089_v62 = vpack.c.bf16 %v1058_v50, %v1057_v44  ;;  %v755_v2 = vadd.f32 1.0, %v1618_v56  ;;  %v1043_v26 = vadd.f32 %v907_v55, %v1955_v63  ;;  %v761_v14 = vand.u32 2147483647, %v1618_v56 }
  0x46   : > { %v1622_v10 = vpop.eup %1621  ;;  %v758_v6 = vmul.f32 -0.5, %v1618_v56  ;;  %v764_v9 = vadd.f32 1.0, %v1620_v61  ;;  %v767_v15 = vmul.f32 -0.5, %v1620_v61  ;;  %v913_v17 = vmul.f32 %v1610_v35, %v912_v0 }
  0x47   : > { %1516 = vmatpush3.bf16.msra.mxu0 %v1089_v62  ;;  %1631 = vlog2.f32 %v755_v2  ;;  %v1624_v12 = vpop.eup %1623  ;;  %v1075_v20 = vmul.f32 %v1608_v49, %v1043_v26  ;;  %vm2031_vm7 = vcmp.lt.f32.partialorder %v761_v14, 0.0004427343  ;;  %v459_v22 = vmul.f32 1.442695, %v422_v37  ;;  %v2040_v49 = vld [vmem:[%s1933_s10 + $0x58] sm:$0xff]  }
  0x48   : > { %1633 = vrcp.f32 %v515_v57  ;;  %v1626_v13 = vpop.eup %1625  ;;  %v759_v24 = vadd.f32 1.0, %v758_v6  ;;  %v770_v25 = vand.u32 2147483647, %v1620_v61  ;;  %v533_v27 = vadd.f32 1.0, %v1624_v12 }
  0x49   : > { %1635 = vlog2.f32 %v764_v9  ;;  %v613_v23 = vand.u32 2147483647, %v1431_v11  ;;  %v1628_v28 = vpop.eup %1627  ;;  %v768_v29 = vadd.f32 1.0, %v767_v15  ;;  %v614_v30 = vand.u32 2147483647, %v1432_v16 }
  0x4a   : > { %1637 = vrcp.f32 %v516_v5  ;;  %v1403_v31 = vunpack.c.l.bf16 %v1495_v19  ;;  %v917_v33 = vadd.f32 1.0, %v1628_v28  ;;  %v920_v34 = vmul.f32 -0.5, %v1628_v28 }
  0x4b   : > { %1639 = vpow2.f32 %v715_v7  ;;  %v1404_v51 = vunpack.c.h.bf16 %v1495_v19  ;;  %v645_v36 = vsub.f32 0.0, %v613_v23  ;;  %v646_v38 = vsub.f32 0.0, %v614_v30  ;;  %v1487_v7 = vld [vmem:[%s1928_s7 + $0x18] sm:$0xff]  }
  0x4c   : > { %1641 = vpow2.f32 %v457_v18  ;;  %v760_v39 = vmul.f32 %v1618_v56, %v759_v24  ;;  %vm2042_vm8 = vcmp.lt.f32.partialorder %v770_v25, 0.0004427343  ;;  %v1467_v41 = vunpack.c.l.bf16 %v2040_v49 }
  0x4d   : > { %v1630_v32 = vpop.eup %1629  ;;  %1643 = vpow2.f32 %v459_v22  ;;  %v681_v44 = vmul.f32 1.442695, %v645_v36  ;;  %v683_v45 = vmul.f32 1.442695, %v646_v38  ;;  %v1468_v46 = vunpack.c.h.bf16 %v2040_v49  ;;  %v2077_v38 = vld [vmem:[%s1933_s10 + $0x18] sm:$0xff]  }
  0x4e   : > { %v910_v35 = vmul.f32 0.6931472, %v1630_v32  ;;  %1645 = vlog2.f32 %v917_v33  ;;  %v769_v47 = vmul.f32 %v1620_v61, %v768_v29  ;;  %v439_v48 = vsub.f32 0.0, %v1403_v31 }
  0x4f   : > { %v440_v50 = vsub.f32 0.0, %v1404_v51  ;;  %v921_v57 = vadd.f32 1.0, %v920_v34  ;;  %v923_v58 = vand.u32 2147483647, %v1628_v28  ;;  %1647 = vpow2.f32 %v681_v44 }
  0x50   : > { %v916_v43 = vsel %vm2026_vm6, %v913_v17, %v910_v35  ;;  %1649 = vpow2.f32 %v683_v45  ;;  %v493_v0 = vmul.f32 1.442695, %v439_v48  ;;  %v632_v61 = vand.u32 2147483647, %v1468_v46 }
  0x51   : > { %v1632_v52 = vpop.eup %1631  ;;  %v1044_v42 = vadd.f32 %v916_v43, %v1957_v3  ;;  %v495_v1 = vmul.f32 1.442695, %v440_v50  ;;  %v631_v3 = vand.u32 2147483647, %v1467_v41  ;;  %v534_v6 = vadd.f32 1.0, %v1626_v13 }
  0x52   : > { %v1634_v56 = vpop.eup %1633  ;;  %v757_v55 = vmul.f32 0.6931472, %v1632_v52  ;;  %1651 = vpow2.f32 %v493_v0  ;;  %v664_v15 = vsub.f32 0.0, %v632_v61  ;;  %v922_v21 = vmul.f32 %v1628_v28, %v921_v57 }
  0x53   : > { %v1636_v60 = vpop.eup %1635  ;;  %v1076_v62 = vmul.f32 %v1622_v10, %v1044_v42  ;;  %1653 = vrcp.f32 %v533_v27  ;;  %v663_v12 = vsub.f32 0.0, %v631_v3  ;;  %vm2060_vm9 = vcmp.lt.f32.partialorder %v923_v58, 0.0004427343 }
  0x54   : > { %v1638_v2 = vpop.eup %1637  ;;  %v763_v26 = vsel %vm2031_vm7, %v760_v39, %v757_v55  ;;  %v766_v5 = vmul.f32 0.6931472, %v1636_v60  ;;  %1655 = vpow2.f32 %v495_v1  ;;  %v1371_v23 = vunpack.c.l.bf16 %v1487_v7  ;;  %v1496_v60 = vld [vmem:[%s1928_s7 + $0x60] sm:$0xff]  }
  0x55   : > { %v1098_v14 = vpack.c.bf16 %v1076_v62, %v1075_v20  ;;  %v1027_v37 = vadd.f32 %v763_v26, %v1959_v4  ;;  %v1640_v9 = vpop.eup %1639  ;;  %v717_v22 = vmul.f32 1.442695, %v663_v12  ;;  %v719_v30 = vmul.f32 1.442695, %v664_v15 }
  0x56   : > { %v772_v10 = vsel %vm2042_vm8, %v769_v47, %v766_v5  ;;  %v1642_v17 = vpop.eup %1641  ;;  %v926_v19 = vadd.f32 1.0, %v1640_v9  ;;  %v929_v13 = vmul.f32 -0.5, %v1640_v9  ;;  %v932_v31 = vand.u32 2147483647, %v1640_v9 }
  0x57   : > { %1517 = vmatprep.subr.bf16.mxu0 %v1098_v14  ;;  %v1028_v63 = vadd.f32 %v772_v10, %v1963_v8  ;;  %v1059_v18 = vmul.f32 %v1634_v56, %v1027_v37  ;;  %v1644_v20 = vpop.eup %1643  ;;  %v517_v27 = vadd.f32 1.0, %v1642_v17  ;;  %v2066_v8 = vmax.f32 %v1431_v11, 0.0 }
  0x58   : > { %v1646_v24 = vpop.eup %1645  ;;  %1657 = vlog2.f32 %v926_v19  ;;  %v2070_v32 = vmax.f32 %v1432_v16, 0.0  ;;  %v2072_v33 = vmax.f32 %v1467_v41, 0.0  ;;  %v930_v35 = vadd.f32 1.0, %v929_v13  ;;  %v2110_v13 = vld [vmem:[%s1933_s10 + $0x60] sm:$0xff]  }
  0x59   : > { %v1060_v25 = vmul.f32 %v1638_v2, %v1028_v63  ;;  %1659 = vrcp.f32 %v534_v6  ;;  %v919_v29 = vmul.f32 0.6931472, %v1646_v24  ;;  %v1648_v34 = vpop.eup %1647  ;;  %v1372_v36 = vunpack.c.h.bf16 %v1487_v7 }
  0x5a   : > { %1661 = vpow2.f32 %v717_v22  ;;  %v1650_v11 = vpop.eup %1649  ;;  %v518_v39 = vadd.f32 1.0, %v1644_v20  ;;  %v773_v40 = vadd.f32 1.0, %v1648_v34  ;;  %v423_v43 = vsub.f32 0.0, %v1371_v23 }
  0x5b   : > { %v1090_v28 = vpack.c.bf16 %v1060_v25, %v1059_v18  ;;  %v925_v51 = vsel %vm2060_vm9, %v922_v21, %v919_v29  ;;  %1663 = vrcp.f32 %v517_v27  ;;  %v776_v59 = vmul.f32 -0.5, %v1648_v34 }
  0x5c   : > { %v782_v16 = vadd.f32 1.0, %v1650_v11  ;;  %v785_v44 = vmul.f32 -0.5, %v1650_v11  ;;  %1665 = vpow2.f32 %v719_v30  ;;  %v1652_v41 = vpop.eup %1651  ;;  %v1045_v45 = vadd.f32 %v925_v51, %v2012_v53 }
  0x5d   : > { %1518 = vmatpush3.bf16.msra.mxu0 %v1090_v28  ;;  %1667 = vlog2.f32 %v773_v40  ;;  %v1435_v52 = vunpack.c.l.bf16 %v2077_v38  ;;  %v1436_v42 = vunpack.c.h.bf16 %v2077_v38  ;;  %v1654_v47 = vpop.eup %1653  ;;  %v931_v48 = vmul.f32 %v1640_v9, %v930_v35 }
  0x5e   : > { %vm2082_vm10 = vcmp.lt.f32.partialorder %v932_v31, 0.0004427343  ;;  %1669 = vlog2.f32 %v782_v16  ;;  %v2088_v56 = vmax.f32 %v1468_v46, 0.0  ;;  %v1656_v55 = vpop.eup %1655  ;;  %v779_v57 = vand.u32 2147483647, %v1648_v34 }
  0x5f   : > { %1671 = vrcp.f32 %v518_v39  ;;  %v424_v53 = vsub.f32 0.0, %v1372_v36  ;;  %v461_v58 = vmul.f32 1.442695, %v423_v43  ;;  %v777_v62 = vadd.f32 1.0, %v776_v59 }
  0x60   : > { %v786_v0 = vadd.f32 1.0, %v785_v44  ;;  %v788_v1 = vand.u32 2147483647, %v1650_v11  ;;  %v535_v2 = vadd.f32 1.0, %v1652_v41  ;;  %v1077_v5 = vmul.f32 %v1654_v47, %v1045_v45 }
  0x61   : > { %v463_v3 = vmul.f32 1.442695, %v424_v53  ;;  %v615_v61 = vand.u32 2147483647, %v1435_v52  ;;  %v616_v49 = vand.u32 2147483647, %v1436_v42  ;;  %1673 = vpow2.f32 %v461_v58 }
  0x62   : > { %v1658_v26 = vpop.eup %1657  ;;  %v536_v37 = vadd.f32 1.0, %v1656_v55  ;;  %v1407_v6 = vunpack.c.l.bf16 %v1496_v60  ;;  %v1408_v12 = vunpack.c.h.bf16 %v1496_v60  ;;  %vm2099_vm11 = vcmp.lt.f32.partialorder %v779_v57, 0.0004427343  ;;  %v1488_v57 = vld [vmem:[%s1928_s7 + $0x20] sm:$0xff]  }
  0x63   : > { %v1660_v46 = vpop.eup %1659  ;;  %v928_v14 = vmul.f32 0.6931472, %v1658_v26  ;;  %1675 = vpow2.f32 %v463_v3  ;;  %v647_v9 = vsub.f32 0.0, %v615_v61  ;;  %v648_v10 = vsub.f32 0.0, %v616_v49 }
  0x64   : > { %v2095_v15 = vpop.eup %1661  ;;  %vm2103_vm12 = vcmp.lt.f32.partialorder %v788_v1, 0.0004427343  ;;  %v441_v18 = vsub.f32 0.0, %v1407_v6  ;;  %v778_v21 = vmul.f32 %v1648_v34, %v777_v62  ;;  %1677 = vrcp.f32 %v535_v2  ;;  %v2128_v1 = vld [vmem:[%s1933_s10 + $0x20] sm:$0xff]  }
  0x65   : > { %v934_v7 = vsel %vm2082_vm10, %v931_v48, %v928_v14  ;;  %v1664_v19 = vpop.eup %1663  ;;  %v935_v4 = vadd.f32 1.0, %v2095_v15  ;;  %v787_v24 = vmul.f32 %v1650_v11, %v786_v0  ;;  %1679 = vrcp.f32 %v536_v37 }
  0x66   : > { %v1046_v20 = vadd.f32 %v934_v7, %v2016_v54  ;;  %v1666_v22 = vpop.eup %1665  ;;  %v938_v25 = vmul.f32 -0.5, %v2095_v15  ;;  %v685_v27 = vmul.f32 1.442695, %v647_v9  ;;  %v687_v30 = vmul.f32 1.442695, %v648_v10 }
  0x67   : > { %v1668_v23 = vpop.eup %1667  ;;  %1681 = vlog2.f32 %v935_v4  ;;  %v442_v28 = vsub.f32 0.0, %v1408_v12  ;;  %v944_v54 = vadd.f32 1.0, %v1666_v22  ;;  %v1471_v34 = vunpack.c.l.bf16 %v2110_v13 }
  0x68   : > { %v1078_v29 = vmul.f32 %v1660_v46, %v1046_v20  ;;  %v1670_v31 = vpop.eup %1669  ;;  %v775_v51 = vmul.f32 0.6931472, %v1668_v23  ;;  %v497_v35 = vmul.f32 1.442695, %v441_v18  ;;  %v947_v43 = vmul.f32 -0.5, %v1666_v22 }
  0x69   : > { %v1672_v36 = vpop.eup %1671  ;;  %v784_v40 = vmul.f32 0.6931472, %v1670_v31  ;;  %1683 = vpow2.f32 %v685_v27  ;;  %v939_v59 = vadd.f32 1.0, %v938_v25  ;;  %v1472_v16 = vunpack.c.h.bf16 %v2110_v13  ;;  %v1497_v27 = vld [vmem:[%s1928_s7 + $0x68] sm:$0xff]  }
  0x6a   : > { %v1099_v39 = vpack.c.bf16 %v1078_v29, %v1077_v5  ;;  %v781_v11 = vsel %vm2099_vm11, %v778_v21, %v775_v51  ;;  %1685 = vlog2.f32 %v944_v54  ;;  %v499_v45 = vmul.f32 1.442695, %v442_v28 }
  0x6b   : > { %v790_v44 = vsel %vm2103_vm12, %v787_v24, %v784_v40  ;;  %v1029_v41 = vadd.f32 %v781_v11, %v2066_v8  ;;  %1687 = vpow2.f32 %v687_v30  ;;  %v1674_v47 = vpop.eup %1673  ;;  %v941_v50 = vand.u32 2147483647, %v2095_v15 }
  0x6c   : > { %1519 = vmatprep.subr.bf16.mxu0 %v1099_v39  ;;  %v1030_v48 = vadd.f32 %v790_v44, %v2070_v32  ;;  %v2124_v55 = vmax.f32 %v1435_v52, 0.0  ;;  %1689 = vpow2.f32 %v497_v35  ;;  %v948_v60 = vadd.f32 1.0, %v947_v43  ;;  %v2164_v44 = vld [vmem:[%s1933_s10 + $0x68] sm:$0xff]  }
  0x6d   : > { %v1676_v53 = vpop.eup %1675  ;;  %v1061_v58 = vmul.f32 %v1664_v19, %v1029_v41  ;;  %v950_v62 = vand.u32 2147483647, %v1666_v22  ;;  %v519_v0 = vadd.f32 1.0, %v1674_v47  ;;  %1691 = vpow2.f32 %v499_v45 }
  0x6e   : > { %v1062_v8 = vmul.f32 %v1672_v36, %v1030_v48  ;;  %v633_v2 = vand.u32 2147483647, %v1471_v34  ;;  %v634_v32 = vand.u32 2147483647, %v1472_v16  ;;  %v1678_v26 = vpop.eup %1677  ;;  %v940_v5 = vmul.f32 %v2095_v15, %v939_v59 }
  0x6f   : > { %v520_v52 = vadd.f32 1.0, %v1676_v53  ;;  %v1375_v3 = vunpack.c.l.bf16 %v1488_v57  ;;  %v1376_v61 = vunpack.c.h.bf16 %v1488_v57  ;;  %v1680_v49 = vpop.eup %1679  ;;  %v1439_v6 = vunpack.c.l.bf16 %v2128_v1 }
  0x70   : > { %v1091_v46 = vpack.c.bf16 %v1062_v8, %v1061_v58  ;;  %v665_v14 = vsub.f32 0.0, %v633_v2  ;;  %v666_v37 = vsub.f32 0.0, %v634_v32  ;;  %vm2134_vm13 = vcmp.lt.f32.partialorder %v941_v50, 0.0004427343 }
  0x71   : > { %v1682_v9 = vpop.eup %1681  ;;  %v949_v12 = vmul.f32 %v1666_v22, %v948_v60  ;;  %vm2138_vm14 = vcmp.lt.f32.partialorder %v950_v62, 0.0004427343  ;;  %v2144_v15 = vmax.f32 %v1436_v42, 0.0  ;;  %1693 = vrcp.f32 %v519_v0 }
  0x72   : > { %1520 = vmatpush3.bf16.msra.mxu0 %v1091_v46  ;;  %v937_v17 = vmul.f32 0.6931472, %v1682_v9  ;;  %v721_v63 = vmul.f32 1.442695, %v665_v14  ;;  %v1440_v18 = vunpack.c.h.bf16 %v2128_v1  ;;  %1695 = vrcp.f32 %v520_v52 }
  0x73   : > { %v1684_v19 = vpop.eup %1683  ;;  %v2147_v20 = vmax.f32 %v1471_v34, 0.0  ;;  %v425_v21 = vsub.f32 0.0, %v1375_v3  ;;  %v426_v4 = vsub.f32 0.0, %v1376_v61  ;;  %v723_v42 = vmul.f32 1.442695, %v666_v37 }
  0x74   : > { %v1686_v22 = vpop.eup %1685  ;;  %v943_v24 = vsel %vm2134_vm13, %v940_v5, %v937_v17  ;;  %v791_v38 = vadd.f32 1.0, %v1684_v19  ;;  %v617_v25 = vand.u32 2147483647, %v1439_v6  ;;  %v794_v28 = vmul.f32 -0.5, %v1684_v19 }
  0x75   : > { %v2154_v23 = vpop.eup %1687  ;;  %v946_v29 = vmul.f32 0.6931472, %v1686_v22  ;;  %v1047_v30 = vadd.f32 %v943_v24, %v2072_v33  ;;  %1697 = vpow2.f32 %v721_v63  ;;  %v797_v51 = vand.u32 2147483647, %v1684_v19  ;;  %v1489_v22 = vld [vmem:[%s1928_s7 + $0x28] sm:$0xff]  }
  0x76   : > { %v1690_v31 = vpop.eup %1689  ;;  %1699 = vlog2.f32 %v791_v38  ;;  %v800_v54 = vadd.f32 1.0, %v2154_v23  ;;  %v618_v34 = vand.u32 2147483647, %v1440_v18  ;;  %v465_v36 = vmul.f32 1.442695, %v425_v21 }
  0x77   : > { %v952_v35 = vsel %vm2138_vm14, %v949_v12, %v946_v29  ;;  %v467_v39 = vmul.f32 1.442695, %v426_v4  ;;  %v1411_v40 = vunpack.c.l.bf16 %v1497_v27  ;;  %v1692_v43 = vpop.eup %1691  ;;  %v1079_v11 = vmul.f32 %v1678_v26, %v1047_v30 }
  0x78   : > { %v1048_v33 = vadd.f32 %v952_v35, %v2088_v56  ;;  %1701 = vlog2.f32 %v800_v54  ;;  %v537_v59 = vadd.f32 1.0, %v1690_v31  ;;  %v795_v41 = vadd.f32 1.0, %v794_v28 }
  0x79   : > { %v803_v45 = vmul.f32 -0.5, %v2154_v23  ;;  %1703 = vpow2.f32 %v723_v42  ;;  %v1412_v47 = vunpack.c.h.bf16 %v1497_v27  ;;  %vm2167_vm15 = vcmp.lt.f32.partialorder %v797_v51, 0.0004427343 }
  0x7a   : > { %v1080_v48 = vmul.f32 %v1680_v49, %v1048_v33  ;;  %v649_v57 = vsub.f32 0.0, %v617_v25  ;;  %v650_v53 = vsub.f32 0.0, %v618_v34  ;;  %v538_v58 = vadd.f32 1.0, %v1692_v43 }
  0x7b   : > { %1705 = vrcp.f32 %v537_v59  ;;  %v1475_v56 = vunpack.c.l.bf16 %v2164_v44  ;;  %v1476_v60 = vunpack.c.h.bf16 %v2164_v44  ;;  %v1694_v62 = vpop.eup %1693  ;;  %v804_v26 = vadd.f32 1.0, %v803_v45 }
  0x7c   : > { %v1100_v0 = vpack.c.bf16 %v1080_v48, %v1079_v11  ;;  %1707 = vpow2.f32 %v465_v36  ;;  %v689_v8 = vmul.f32 1.442695, %v649_v57  ;;  %v691_v2 = vmul.f32 1.442695, %v650_v53  ;;  %v1696_v32 = vpop.eup %1695  ;;  %v2209_v48 = vld [vmem:[%s1933_s10 + $0x28] sm:$0xff]  }
  0x7d   : > { %1709 = vpow2.f32 %v467_v39  ;;  %v443_v5 = vsub.f32 0.0, %v1411_v40  ;;  %v444_v52 = vsub.f32 0.0, %v1412_v47  ;;  %v806_v3 = vand.u32 2147483647, %v2154_v23 }
  0x7e   : > { %1521 = vmatprep.subr.bf16.mxu0 %v1100_v0  ;;  %1711 = vpow2.f32 %v689_v8  ;;  %v635_v61 = vand.u32 2147483647, %v1475_v56  ;;  %v636_v49 = vand.u32 2147483647, %v1476_v60  ;;  %v796_v14 = vmul.f32 %v1684_v19, %v795_v41 }
  0x7f   : > { %v1698_v46 = vpop.eup %1697  ;;  %1713 = vpow2.f32 %v691_v2  ;;  %v501_v37 = vmul.f32 1.442695, %v443_v5  ;;  %v503_v9 = vmul.f32 1.442695, %v444_v52  ;;  %v805_v21 = vmul.f32 %v2154_v23, %v804_v26 }
  0x80   : > { %v1700_v10 = vpop.eup %1699  ;;  %1715 = vrcp.f32 %v538_v58  ;;  %v953_v12 = vadd.f32 1.0, %v1698_v46  ;;  %v956_v7 = vmul.f32 -0.5, %v1698_v46  ;;  %v667_v17 = vsub.f32 0.0, %v635_v61 }
  0x81   : > { %v793_v63 = vmul.f32 0.6931472, %v1700_v10  ;;  %1717 = vpow2.f32 %v501_v37  ;;  %v668_v4 = vsub.f32 0.0, %v636_v49  ;;  %vm2180_vm0 = vcmp.lt.f32.partialorder %v806_v3, 0.0004427343 }
  0x82   : > { %v1702_v24 = vpop.eup %1701  ;;  %1719 = vlog2.f32 %v953_v12  ;;  %v959_v19 = vand.u32 2147483647, %v1698_v46  ;;  %v725_v42 = vmul.f32 1.442695, %v667_v17  ;;  %v957_v28 = vadd.f32 1.0, %v956_v7 }
  0x83   : > { %v1704_v25 = vpop.eup %1703  ;;  %v799_v27 = vsel %vm2167_vm15, %v796_v14, %v793_v63  ;;  %v802_v29 = vmul.f32 0.6931472, %v1702_v24  ;;  %1721 = vpow2.f32 %v503_v9  ;;  %v727_v30 = vmul.f32 1.442695, %v668_v4 }
  0x84   : > { %v1031_v23 = vadd.f32 %v799_v27, %v2124_v55  ;;  %v962_v31 = vadd.f32 1.0, %v1704_v25  ;;  %v965_v51 = vmul.f32 -0.5, %v1704_v25  ;;  %v2193_v35 = vmax.f32 %v1472_v16, 0.0 }
  0x85   : > { %v2187_v54 = vpop.eup %1705  ;;  %v808_v34 = vsel %vm2180_vm0, %v805_v21, %v802_v29  ;;  %1723 = vpow2.f32 %v725_v42  ;;  %v1379_v36 = vunpack.c.l.bf16 %v1489_v22  ;;  %v2198_v55 = vmax.f32 %v1439_v6, 0.0 }
  0x86   : > { %v1708_v39 = vpop.eup %1707  ;;  %v1032_v40 = vadd.f32 %v808_v34, %v2144_v15  ;;  %v1063_v43 = vmul.f32 %v1694_v62, %v1031_v23  ;;  %1725 = vlog2.f32 %v962_v31  ;;  %vm2200_vm1 = vcmp.lt.f32.partialorder %v959_v19, 0.0004427343  ;;  %v1498_v31 = vld [vmem:[%s1928_s7 + $0x70] sm:$0xff]  }
  0x87   : > { %v1710_v33 = vpop.eup %1709  ;;  %v2206_v13 = vmax.f32 %v1440_v18, 0.0  ;;  %1727 = vpow2.f32 %v727_v30  ;;  %v1380_v16 = vunpack.c.h.bf16 %v1489_v22  ;;  %v958_v15 = vmul.f32 %v1698_v46, %v957_v28 }
  0x88   : > { %v1712_v59 = vpop.eup %1711  ;;  %v1064_v41 = vmul.f32 %v1696_v32, %v1032_v40  ;;  %v966_v45 = vadd.f32 1.0, %v965_v51  ;;  %v968_v47 = vand.u32 2147483647, %v1704_v25  ;;  %v521_v50 = vadd.f32 1.0, %v1708_v39 }
  0x89   : > { %v1714_v6 = vpop.eup %1713  ;;  %v809_v57 = vadd.f32 1.0, %v1712_v59  ;;  %v812_v53 = vmul.f32 -0.5, %v1712_v59  ;;  %v427_v58 = vsub.f32 0.0, %v1379_v36  ;;  %v522_v8 = vadd.f32 1.0, %v1710_v33  ;;  %v2247_v33 = vld [vmem:[%s1933_s10 + $0x70] sm:$0xff]  }
  0x8a   : > { %v1716_v62 = vpop.eup %1715  ;;  %v1092_v0 = vpack.c.bf16 %v1064_v41, %v1063_v43  ;;  %v818_v1 = vadd.f32 1.0, %v1714_v6  ;;  %v821_v18 = vmul.f32 -0.5, %v1714_v6  ;;  %v815_v5 = vand.u32 2147483647, %v1712_v59 }
  0x8b   : > { %v1718_v2 = vpop.eup %1717  ;;  %1729 = vlog2.f32 %v809_v57  ;;  %v813_v26 = vadd.f32 1.0, %v812_v53  ;;  %v1443_v32 = vunpack.c.l.bf16 %v2209_v48  ;;  %vm2212_vm2 = vcmp.lt.f32.partialorder %v968_v47, 0.0004427343 }
  0x8c   : > { %v1720_v52 = vpop.eup %1719  ;;  %1522 = vmatpush3.bf16.msra.mxu0 %v1092_v0  ;;  %1731 = vlog2.f32 %v818_v1  ;;  %v539_v61 = vadd.f32 1.0, %v1718_v2  ;;  %v428_v49 = vsub.f32 0.0, %v1380_v16  ;;  %v1444_v37 = vunpack.c.h.bf16 %v2209_v48 }
  0x8d   : > { %v1722_v46 = vpop.eup %1721  ;;  %v955_v14 = vmul.f32 0.6931472, %v1720_v52  ;;  %1733 = vrcp.f32 %v521_v50  ;;  %v469_v9 = vmul.f32 1.442695, %v427_v58  ;;  %v967_v10 = vmul.f32 %v1704_v25, %v966_v45 }
  0x8e   : > { %1735 = vrcp.f32 %v522_v8  ;;  %v822_v12 = vadd.f32 1.0, %v821_v18  ;;  %v824_v7 = vand.u32 2147483647, %v1714_v6  ;;  %v814_v21 = vmul.f32 %v1712_v59, %v813_v26 }
  0x8f   : > { %v2217_v17 = vpop.eup %1723  ;;  %v961_v63 = vsel %vm2200_vm1, %v958_v15, %v955_v14  ;;  %vm2221_vm3 = vcmp.lt.f32.partialorder %v815_v5, 0.0004427343  ;;  %v540_v22 = vadd.f32 1.0, %v1722_v46  ;;  %1737 = vrcp.f32 %v539_v61 }
  0x90   : > { %v1726_v24 = vpop.eup %1725  ;;  %v1049_v38 = vadd.f32 %v961_v63, %v2147_v20  ;;  %v971_v19 = vadd.f32 1.0, %v2217_v17  ;;  %v471_v42 = vmul.f32 1.442695, %v428_v49  ;;  %v974_v29 = vmul.f32 -0.5, %v2217_v17 }
  0x91   : > { %v2227_v25 = vpop.eup %1727  ;;  %v964_v27 = vmul.f32 0.6931472, %v1726_v24  ;;  %1739 = vpow2.f32 %v469_v9  ;;  %v619_v30 = vand.u32 2147483647, %v1443_v32  ;;  %v823_v23 = vmul.f32 %v1714_v6, %v822_v12 }
  0x92   : > { %vm2232_vm4 = vcmp.lt.f32.partialorder %v824_v7, 0.0004427343  ;;  %1741 = vlog2.f32 %v971_v19  ;;  %v980_v20 = vadd.f32 1.0, %v2227_v25  ;;  %v977_v34 = vand.u32 2147483647, %v2217_v17 }
  0x93   : > { %v970_v51 = vsel %vm2212_vm2, %v967_v10, %v964_v27  ;;  %1743 = vrcp.f32 %v540_v22  ;;  %v983_v36 = vmul.f32 -0.5, %v2227_v25  ;;  %v1081_v40 = vmul.f32 %v2187_v54, %v1049_v38 }
  0x94   : > { %v1050_v39 = vadd.f32 %v970_v51, %v2193_v35  ;;  %1745 = vlog2.f32 %v980_v20  ;;  %v620_v43 = vand.u32 2147483647, %v1444_v37  ;;  %v975_v16 = vadd.f32 1.0, %v974_v29  ;;  %v2276_v51 = vld [vmem:[%s1933_s10 + $0x30] sm:$0xff]  }
  0x95   : > { %v1730_v11 = vpop.eup %1729  ;;  %1747 = vpow2.f32 %v471_v42  ;;  %v651_v59 = vsub.f32 0.0, %v619_v30  ;;  %v1415_v41 = vunpack.c.l.bf16 %v1498_v31  ;;  %v1416_v50 = vunpack.c.h.bf16 %v1498_v31 }
  0x96   : > { %v1732_v15 = vpop.eup %1731  ;;  %v1082_v45 = vmul.f32 %v1716_v62, %v1050_v39  ;;  %v811_v47 = vmul.f32 0.6931472, %v1730_v11  ;;  %v652_v6 = vsub.f32 0.0, %v620_v43  ;;  %v984_v53 = vadd.f32 1.0, %v983_v36 }
  0x97   : > { %v1734_v57 = vpop.eup %1733  ;;  %v820_v35 = vmul.f32 0.6931472, %v1732_v15  ;;  %v693_v54 = vmul.f32 1.442695, %v651_v59  ;;  %v1479_v58 = vunpack.c.l.bf16 %v2247_v33  ;;  %v1480_v2 = vunpack.c.h.bf16 %v2247_v33 }
  0x98   : > { %v1736_v0 = vpop.eup %1735  ;;  %v1101_v8 = vpack.c.bf16 %v1082_v45, %v1081_v40  ;;  %v817_v1 = vsel %vm2221_vm3, %v814_v21, %v811_v47  ;;  %v695_v18 = vmul.f32 1.442695, %v652_v6  ;;  %v445_v5 = vsub.f32 0.0, %v1415_v41  ;;  %v1490_v21 = vld [vmem:[%s1928_s7 + $0x30] sm:$0xff]  }
  0x99   : > { %v826_v62 = vsel %vm2232_vm4, %v823_v23, %v820_v35  ;;  %v1033_v26 = vadd.f32 %v817_v1, %v2198_v55  ;;  %1749 = vpow2.f32 %v693_v54  ;;  %v1738_v52 = vpop.eup %1737  ;;  %v986_v61 = vand.u32 2147483647, %v2227_v25 }
  0x9a   : > { %1523 = vmatprep.subr.bf16.mxu0 %v1101_v8  ;;  %v1034_v3 = vadd.f32 %v826_v62, %v2206_v13  ;;  %1751 = vpow2.f32 %v695_v18  ;;  %v446_v49 = vsub.f32 0.0, %v1416_v50  ;;  %v976_v9 = vmul.f32 %v2217_v17, %v975_v16 }
  0x9b   : > { %v1740_v46 = vpop.eup %1739  ;;  %v1065_v14 = vmul.f32 %v1734_v57, %v1033_v26  ;;  %v603_v55 = vmax.f32 %v1475_v56, 0.0  ;;  %vm2261_vm5 = vcmp.lt.f32.partialorder %v977_v34, 0.0004427343  ;;  %v505_v63 = vmul.f32 1.442695, %v445_v5  ;;  %v2302_v5 = vld [vmem:[%s1933_s10 + $0x78] sm:$0xff]  }
  0x9c   : > { %v1742_v10 = vpop.eup %1741  ;;  %v1066_v12 = vmul.f32 %v1736_v0, %v1034_v3  ;;  %v985_v22 = vmul.f32 %v2227_v25, %v984_v53  ;;  %v637_v24 = vand.u32 2147483647, %v1479_v58  ;;  %v638_v17 = vand.u32 2147483647, %v1480_v2  ;;  %v1499_v0 = vld [vmem:[%s1928_s7 + $0x78] sm:$0xff]  }
  0x9d   : > { %v1744_v13 = vpop.eup %1743  ;;  %v973_v4 = vmul.f32 0.6931472, %v1742_v10  ;;  %v604_v56 = vmax.f32 %v1476_v60, 0.0  ;;  %vm987_vm6 = vcmp.lt.f32.partialorder %v986_v61, 0.0004427343  ;;  %v1383_v23 = vunpack.c.l.bf16 %v1490_v21 }
  0x9e   : > { %v1746_v38 = vpop.eup %1745  ;;  %v1093_v19 = vpack.c.bf16 %v1066_v12, %v1065_v14  ;;  %v507_v42 = vmul.f32 1.442695, %v446_v49  ;;  %v669_v25 = vsub.f32 0.0, %v637_v24  ;;  %v670_v20 = vsub.f32 0.0, %v638_v17 }
  0x9f   : > { %v1748_v27 = vpop.eup %1747  ;;  %v979_v29 = vsel %vm2261_vm5, %v976_v9, %v973_v4  ;;  %v982_v30 = vmul.f32 0.6931472, %v1746_v38  ;;  %v1384_v31 = vunpack.c.h.bf16 %v1490_v21  ;;  %1753 = vpow2.f32 %v505_v63 }
  0xa0   : > { %1524 = vmatpush3.bf16.msra.mxu0 %v1093_v19  ;;  %v1051_v28 = vadd.f32 %v979_v29, %v603_v55  ;;  %v729_v36 = vmul.f32 1.442695, %v669_v25  ;;  %1755 = vpow2.f32 %v507_v42  ;;  %v731_v39 = vmul.f32 1.442695, %v670_v20 }
  0xa1   : > { %v988_v34 = vsel %vm987_vm6, %v985_v22, %v982_v30  ;;  %v523_v43 = vadd.f32 1.0, %v1740_v46  ;;  %v1447_v11 = vunpack.c.l.bf16 %v2276_v51  ;;  %v429_v16 = vsub.f32 0.0, %v1383_v23 }
  0xa2   : > { %v1052_v44 = vadd.f32 %v988_v34, %v604_v56  ;;  %v1083_v60 = vmul.f32 %v1738_v52, %v1051_v28  ;;  %1757 = vpow2.f32 %v729_v36  ;;  %v1448_v45 = vunpack.c.h.bf16 %v2276_v51 }
  0xa3   : > { %v1750_v40 = vpop.eup %1749  ;;  %v430_v47 = vsub.f32 0.0, %v1384_v31  ;;  %v524_v6 = vadd.f32 1.0, %v1748_v27  ;;  %v2284_v50 = vmax.f32 %v1443_v32, 0.0  ;;  %1759 = vpow2.f32 %v731_v39 }
  0xa4   : > { %v2279_v59 = vpop.eup %1751  ;;  %v1084_v41 = vmul.f32 %v1744_v13, %v1052_v44  ;;  %v827_v15 = vadd.f32 1.0, %v1750_v40  ;;  %v830_v53 = vmul.f32 -0.5, %v1750_v40  ;;  %v2291_v8 = vmax.f32 %v1444_v37, 0.0 }
  0xa5   : > { %v836_v57 = vadd.f32 1.0, %v2279_v59  ;;  %v839_v54 = vmul.f32 -0.5, %v2279_v59  ;;  %v473_v1 = vmul.f32 1.442695, %v429_v16  ;;  %v621_v32 = vand.u32 2147483647, %v1447_v11 }
  0xa6   : > { %v1102_v35 = vpack.c.bf16 %v1084_v41, %v1083_v60  ;;  %1761 = vlog2.f32 %v827_v15  ;;  %v2297_v18 = vmax.f32 %v1479_v58, 0.0  ;;  %v475_v62 = vmul.f32 1.442695, %v430_v47 }
  0xa7   : > { %1763 = vlog2.f32 %v836_v57  ;;  %v622_v26 = vand.u32 2147483647, %v1448_v45  ;;  %v833_v48 = vand.u32 2147483647, %v1750_v40  ;;  %v653_v37 = vsub.f32 0.0, %v621_v32  ;;  %v1491_v57 = vld [vmem:[%s1928_s7 + $0x38] sm:$0xff]  }
  0xa8   : > { %1525 = vmatprep.subr.bf16.mxu0 %v1102_v35  ;;  %1765 = vrcp.f32 %v523_v43  ;;  %v1419_v52 = vunpack.c.l.bf16 %v1499_v0  ;;  %v831_v3 = vadd.f32 1.0, %v830_v53  ;;  %v840_v61 = vadd.f32 1.0, %v839_v54 }
  0xa9   : > { %1767 = vrcp.f32 %v524_v6  ;;  %v654_v49 = vsub.f32 0.0, %v622_v26  ;;  %v1420_v46 = vunpack.c.h.bf16 %v1499_v0  ;;  %v1754_v14 = vpop.eup %1753  ;;  %v697_v9 = vmul.f32 1.442695, %v653_v37 }
  0xaa   : > { %1769 = vpow2.f32 %v473_v1  ;;  %v1483_v58 = vunpack.c.l.bf16 %v2302_v5  ;;  %v447_v10 = vsub.f32 0.0, %v1419_v52  ;;  %v1756_v12 = vpop.eup %1755  ;;  %v1484_v7 = vunpack.c.h.bf16 %v2302_v5 }
  0xab   : > { %1771 = vpow2.f32 %v475_v62  ;;  %v699_v55 = vmul.f32 1.442695, %v654_v49  ;;  %v448_v63 = vsub.f32 0.0, %v1420_v46  ;;  %vm2306_vm7 = vcmp.lt.f32.partialorder %v833_v48, 0.0004427343  ;;  %v2340_v49 = vld [vmem:[%s1933_s10 + $0x38] sm:$0xff]  }
  0xac   : > { %v1758_v21 = vpop.eup %1757  ;;  %v842_v4 = vand.u32 2147483647, %v2279_v59  ;;  %1773 = vpow2.f32 %v697_v9  ;;  %v509_v22 = vmul.f32 1.442695, %v447_v10  ;;  %v832_v24 = vmul.f32 %v1750_v40, %v831_v3 }
  0xad   : > { %v541_v17 = vadd.f32 1.0, %v1754_v14  ;;  %v989_v38 = vadd.f32 1.0, %v1758_v21  ;;  %1775 = vpow2.f32 %v699_v55  ;;  %v1760_v19 = vpop.eup %1759  ;;  %v841_v56 = vmul.f32 %v2279_v59, %v840_v61 }
  0xae   : > { %1777 = vpow2.f32 %v509_v22  ;;  %v511_v42 = vmul.f32 1.442695, %v448_v63  ;;  %v639_v27 = vand.u32 2147483647, %v1483_v58  ;;  %v992_v30 = vmul.f32 -0.5, %v1758_v21 }
  0xaf   : > { %1779 = vlog2.f32 %v989_v38  ;;  %v998_v25 = vadd.f32 1.0, %v1760_v19  ;;  %v640_v23 = vand.u32 2147483647, %v1484_v7  ;;  %vm2316_vm8 = vcmp.lt.f32.partialorder %v842_v4, 0.0004427343 }
  0xb0   : > { %v1762_v29 = vpop.eup %1761  ;;  %v542_v34 = vadd.f32 1.0, %v1756_v12  ;;  %1781 = vpow2.f32 %v511_v42  ;;  %v1001_v60 = vmul.f32 -0.5, %v1760_v19  ;;  %v671_v39 = vsub.f32 0.0, %v639_v27 }
  0xb1   : > { %v1764_v28 = vpop.eup %1763  ;;  %v829_v20 = vmul.f32 0.6931472, %v1762_v29  ;;  %1783 = vlog2.f32 %v998_v25  ;;  %v2324_v16 = vmax.f32 %v1480_v2, 0.0  ;;  %v995_v59 = vand.u32 2147483647, %v1758_v21 }
  0xb2   : > { %v1766_v36 = vpop.eup %1765  ;;  %v838_v44 = vmul.f32 0.6931472, %v1764_v28  ;;  %1785 = vrcp.f32 %v541_v17  ;;  %v993_v47 = vadd.f32 1.0, %v992_v30  ;;  %v672_v6 = vsub.f32 0.0, %v640_v23 }
  0xb3   : > { %v1768_v40 = vpop.eup %1767  ;;  %v835_v43 = vsel %vm2306_vm7, %v832_v24, %v829_v20  ;;  %1787 = vrcp.f32 %v542_v34  ;;  %v1004_v54 = vand.u32 2147483647, %v1760_v19  ;;  %v733_v0 = vmul.f32 1.442695, %v671_v39 }
  0xb4   : > { %v844_v41 = vsel %vm2316_vm8, %v841_v56, %v838_v44  ;;  %v1035_v15 = vadd.f32 %v835_v43, %v2284_v50  ;;  %v1770_v35 = vpop.eup %1769  ;;  %v1002_v2 = vadd.f32 1.0, %v1001_v60  ;;  %v2333_v32 = vmax.f32 %v1447_v11, 0.0 }
  0xb5   : > { %v1036_v53 = vadd.f32 %v844_v41, %v2291_v8  ;;  %v1772_v1 = vpop.eup %1771  ;;  %v735_v62 = vmul.f32 1.442695, %v672_v6  ;;  %vm2335_vm9 = vcmp.lt.f32.partialorder %v995_v59, 0.0004427343  ;;  %1789 = vpow2.f32 %v733_v0 }
  0xb6   : > { %v1067_v33 = vmul.f32 %v1766_v36, %v1035_v15  ;;  %v1774_v26 = vpop.eup %1773  ;;  %v1387_v8 = vunpack.c.l.bf16 %v1491_v57  ;;  %v994_v52 = vmul.f32 %v1758_v21, %v993_v47  ;;  %v525_v3 = vadd.f32 1.0, %v1770_v35 }
  0xb7   : > { %v1068_v50 = vmul.f32 %v1768_v40, %v1036_v53  ;;  %v1776_v37 = vpop.eup %1775  ;;  %v845_v61 = vadd.f32 1.0, %v1774_v26  ;;  %1791 = vpow2.f32 %v735_v62  ;;  %vm2342_vm10 = vcmp.lt.f32.partialorder %v1004_v54, 0.0004427343 }
  0xb8   : > { %v1778_v46 = vpop.eup %1777  ;;  %v848_v9 = vmul.f32 -0.5, %v1774_v26  ;;  %v854_v10 = vadd.f32 1.0, %v1776_v37  ;;  %v1003_v55 = vmul.f32 %v1760_v19, %v1002_v2  ;;  %v526_v63 = vadd.f32 1.0, %v1772_v1 }
  0xb9   : > { %v1094_v14 = vpack.c.bf16 %v1068_v50, %v1067_v33  ;;  %v1780_v12 = vpop.eup %1779  ;;  %1793 = vlog2.f32 %v845_v61  ;;  %v1388_v13 = vunpack.c.h.bf16 %v1491_v57  ;;  %v857_v22 = vmul.f32 -0.5, %v1776_v37 }
  0xba   : > { %v1782_v4 = vpop.eup %1781  ;;  %v991_v21 = vmul.f32 0.6931472, %v1780_v12  ;;  %1795 = vlog2.f32 %v854_v10  ;;  %v1451_v24 = vunpack.c.l.bf16 %v2340_v49  ;;  %v851_v38 = vand.u32 2147483647, %v1774_v26 }
  0xbb   : > { %1526 = vmatpush3.bf16.msra.mxu0 %v1094_v14  ;;  %v1784_v17 = vpop.eup %1783  ;;  %1797 = vrcp.f32 %v525_v3  ;;  %v543_v56 = vadd.f32 1.0, %v1778_v46  ;;  %v1452_v42 = vunpack.c.h.bf16 %v2340_v49  ;;  %v849_v30 = vadd.f32 1.0, %v848_v9 }
  0xbc   : > { %v1786_v27 = vpop.eup %1785  ;;  %v997_v19 = vsel %vm2335_vm9, %v994_v52, %v991_v21  ;;  %v1000_v29 = vmul.f32 0.6931472, %v1784_v17  ;;  %v544_v25 = vadd.f32 1.0, %v1782_v4  ;;  %1799 = vrcp.f32 %v526_v63  ;;  %v2380_v63 = vld [vmem:[%s267_s27] sm:$0x3] }
  0xbd   : > { %v1053_v23 = vadd.f32 %v997_v19, %v2297_v18  ;;  %v860_v28 = vand.u32 2147483647, %v1776_v37  ;;  %v431_v20 = vsub.f32 0.0, %v1387_v8  ;;  %v1788_v31 = vpop.eup %1787  ;;  %v858_v36 = vadd.f32 1.0, %v857_v22 }
  0xbe   : > { %v1006_v34 = vsel %vm2342_vm10, %v1003_v55, %v1000_v29  ;;  %v432_v44 = vsub.f32 0.0, %v1388_v13  ;;  %v623_v60 = vand.u32 2147483647, %v1451_v24  ;;  %1801 = vrcp.f32 %v543_v56 }
  0xbf   : > { %v1054_v39 = vadd.f32 %v1006_v34, %v2324_v16  ;;  %v1085_v40 = vmul.f32 %v1786_v27, %v1053_v23  ;;  %v624_v43 = vand.u32 2147483647, %v1452_v42  ;;  %v1790_v18 = vpop.eup %1789  ;;  %v590_v59 = vmax.f32 %v1448_v45, 0.0 }
  0xc0   : > { %v850_v41 = vmul.f32 %v1774_v26, %v849_v30  ;;  %vm2360_vm11 = vcmp.lt.f32.partialorder %v851_v38, 0.0004427343  ;;  %1803 = vrcp.f32 %v544_v25  ;;  %v1007_v57 = vadd.f32 1.0, %v1790_v18 }
  0xc1   : > { %v1792_v47 = vpop.eup %1791  ;;  %v1086_v6 = vmul.f32 %v1788_v31, %v1054_v39  ;;  %v477_v35 = vmul.f32 1.442695, %v431_v20  ;;  %v655_v16 = vsub.f32 0.0, %v623_v60  ;;  %v479_v54 = vmul.f32 1.442695, %v432_v44 }
  0xc2   : > { %v1016_v53 = vadd.f32 1.0, %v1792_v47  ;;  %v656_v0 = vsub.f32 0.0, %v624_v43  ;;  %v1105_v1 = vlaneseq  ;;  %v859_v62 = vmul.f32 %v1776_v37, %v858_v36 }
  0xc3   : > { %v1794_v33 = vpop.eup %1793  ;;  %v1103_v2 = vpack.c.bf16 %v1086_v6, %v1085_v40  ;;  %vm2364_vm12 = vcmp.lt.f32.partialorder %v860_v28, 0.0004427343  ;;  %1805 = vlog2.f32 %v1007_v57  ;;  %v1010_v50 = vmul.f32 -0.5, %v1790_v18 }
  0xc4   : > { %v1796_v45 = vpop.eup %1795  ;;  %v847_v26 = vmul.f32 0.6931472, %v1794_v33  ;;  %1807 = vlog2.f32 %v1016_v53  ;;  %v1019_v48 = vmul.f32 -0.5, %v1792_v47  ;;  %v701_v3 = vmul.f32 1.442695, %v655_v16 }
  0xc5   : > { %v1798_v8 = vpop.eup %1797  ;;  %1527 = vmatprep.subr.bf16.mxu0 %v1103_v2  ;;  %v856_v52 = vmul.f32 0.6931472, %v1796_v45  ;;  %1809 = vpow2.f32 %v477_v35  ;;  %v703_v61 = vmul.f32 1.442695, %v656_v0  ;;  %v2370_v46 = vshrl.u32 %v1105_v1, 7 }
  0xc6   : > { %v853_v37 = vsel %vm2360_vm11, %v850_v41, %v847_v26  ;;  %1811 = vpow2.f32 %v479_v54  ;;  %v1800_v14 = vpop.eup %1799  ;;  %v1011_v12 = vadd.f32 1.0, %v1010_v50  ;;  %v1013_v55 = vand.u32 2147483647, %v1790_v18 }
  0xc7   : > { %v862_v11 = vsel %vm2364_vm12, %v859_v62, %v856_v52  ;;  %v1037_v9 = vadd.f32 %v853_v37, %v2333_v32  ;;  %1813 = vpow2.f32 %v701_v3  ;;  %v1020_v21 = vadd.f32 1.0, %v1019_v48 }
  0xc8   : > { %v1038_v10 = vadd.f32 %v862_v11, %v590_v59  ;;  %1815 = vpow2.f32 %v703_v61  ;;  %v1802_v13 = vpop.eup %1801  ;;  %v2383_v22 = vadd.s32 8, %v2370_v46  ;;  %v1115_v17 = vsub.s32 1, %v2370_v46 }
  0xc9   : > { %v1069_v4 = vmul.f32 %v1798_v8, %v1037_v9  ;;  %v1022_v56 = vand.u32 2147483647, %v1792_v47  ;;  %v607_v29 = vmax.f32 %v1483_v58, 0.0  ;;  %v1012_v30 = vmul.f32 %v1790_v18, %v1011_v12 }
  0xca   : > { %v1804_v32 = vpop.eup %1803  ;;  %v1070_v38 = vmul.f32 %v1800_v14, %v1038_v10  ;;  %v1116_v27 = vrot.slane %v2380_v63, %v1115_v17  ;;  %vm2389_vm13 = vcmp.lt.f32.partialorder %v1013_v55, 0.0004427343  ;;  %v1021_v28 = vmul.f32 %v1792_v47, %v1020_v21  ;;  %v1132_v17 = vld [vmem:[#allocation2 + $0x8] sm:$0xff] }
  0xcb   : > { %v608_v31 = vmax.f32 %v1484_v7, 0.0  ;;  %vm1023_vm0 = vcmp.lt.f32.partialorder %v1022_v56, 0.0004427343  ;;  %v1866_v44 = vmov 1.0|1.0   ;;  %v591_v51 = vmax.f32 %v1451_v24, 0.0 }
  0xcc   : > { %v1095_v19 = vpack.c.bf16 %v1070_v38, %v1069_v4  ;;  %vm1118_vm14 = vcmp.eq.s32.totalorder %v2370_v46, %v1116_v27  ;;  %vm1120_vm15 = vcmp.eq.s32.totalorder %v2383_v22, %v1116_v27  ;;  %v1111_v26 = vsub.s32 0, %v2370_v46  ;;  %v1826_v27 = vld [vmem:[%s2458_s4 + $0x8] sm:$0xff] (!%p1348_p6)  }
  0xcd   : > { %v1806_v25 = vpop.eup %1805  ;;  %vm1344_vm1 = vmpackc.low %vm1120_vm15, %vm1118_vm14  ;;  %v592_v48 = vmax.f32 %v1452_v42, 0.0  ;;  %v1131_v42 = vld [vmem:[#allocation2] sm:$0xff]  ;;  %vm1176_vm7 = vcmask 261120   ;;  %vm1868_vm8 = vmmov (!%p1348_p6), 0  }
  0xce   : > { %v1808_v20 = vpop.eup %1807  ;;  %1528 = vmatpush3.bf16.msra.mxu0 %v1095_v19  ;;  %v1009_v34 = vmul.f32 0.6931472, %v1806_v25  ;;  %1345 = vmatprep.mubr.msk.bf16.mxu0 %vm1344_vm1, %v1866_v44  ;;  %v1112_v9 = vrot.slane %v2380_v63, %v1111_v26  ;;  %v1183_v19 = vld [vmem:[%s2457_s3] sm:$0xff] (!%p1348_p6) }
  0xcf   : > { %v1810_v58 = vpop.eup %1809  ;;  %v1018_v36 = vmul.f32 0.6931472, %v1808_v20 }
  0xd0   : > { %v1812_v60 = vpop.eup %1811  ;;  %v1015_v39 = vsel %vm2389_vm13, %v1012_v30, %v1009_v34  ;;  %v527_v5 = vadd.f32 1.0, %v1810_v58  ;;  %vm1117_vm4 = vcmp.eq.s32.totalorder %v2370_v46, %v1112_v9  ;;  %vm1119_vm5 = vcmp.eq.s32.totalorder %v2383_v22, %v1112_v9  ;;  %v1825_v46 = vld [vmem:[%s2458_s4] sm:$0xff] (!%p1348_p6)  }
  0xd1   : > { %v1814_v40 = vpop.eup %1813  ;;  %v1024_v43 = vsel %vm1023_vm0, %v1021_v28, %v1018_v36  ;;  %v1055_v18 = vadd.f32 %v1015_v39, %v607_v29  ;;  %v528_v57 = vadd.f32 1.0, %v1812_v60  ;;  %vm1346_vm6 = vmpackc.low %vm1119_vm5, %vm1117_vm4  ;;  %v1867_v22 = vmov (!%p1348_p6), 0.0   ;;  %v1184_v29 = vld [vmem:[%s2457_s3 + $0x8] sm:$0xff] (!%p1348_p6) }
  0xd2   : > { %v1816_v59 = vpop.eup %1815  ;;  %v1056_v41 = vadd.f32 %v1024_v43, %v608_v31  ;;  %v863_v15 = vadd.f32 1.0, %v1814_v40  ;;  %v866_v35 = vmul.f32 -0.5, %v1814_v40  ;;  %v869_v0 = vand.u32 2147483647, %v1814_v40  ;;  %v1349_v31 = vld [vmem:[%s2459_s5] ss:$0 sm:$0xff] (!%p1348_p6) }
  0xd3   : > { %v1087_v47 = vmul.f32 %v1802_v13, %v1055_v18  ;;  %v872_v7 = vadd.f32 1.0, %v1816_v59  ;;  %v875_v53 = vmul.f32 -0.5, %v1816_v59  ;;  %v878_v33 = vand.u32 2147483647, %v1816_v59 }
  0xd4   : > { %v1088_v6 = vmul.f32 %v1804_v32, %v1056_v41  ;;  %1817 = vlog2.f32 %v863_v15  ;;  %v867_v54 = vadd.f32 1.0, %v866_v35  ;;  %vm870_vm2 = vcmp.lt.f32.partialorder %v869_v0, 0.0004427343 }
  0xd5   : > { %1819 = vlog2.f32 %v872_v7  ;;  %v876_v1 = vadd.f32 1.0, %v875_v53  ;;  %vm879_vm3 = vcmp.lt.f32.partialorder %v878_v33, 0.0004427343 }
  0xd6   : > { %v1104_v16 = vpack.c.bf16 %v1088_v6, %v1087_v47  ;;  %1821 = vrcp.f32 %v527_v5  ;;  %v868_v2 = vmul.f32 %v1814_v40, %v867_v54 }
  0xd7   : > { %1823 = vrcp.f32 %v528_v57  ;;  %v877_v45 = vmul.f32 %v1816_v59, %v876_v1 }
  0xd8   : > { %1529 = vmatprep.subr.bf16.mxu0 %v1104_v16 }
  0xde   : > { %v1818_v62 = vpop.eup %1817 }
  0xdf   : > { %v1820_v50 = vpop.eup %1819  ;;  %v865_v8 = vmul.f32 0.6931472, %v1818_v62 }
  0xe0   : > { %v874_v52 = vmul.f32 0.6931472, %v1820_v50  ;;  %v1822_v3 = vpop.eup %1821 }
  0xe1   : > { %v871_v61 = vsel %vm870_vm2, %v868_v2, %v865_v8  ;;  %v1824_v37 = vpop.eup %1823 }
  0xe2   : > { %v880_v14 = vsel %vm879_vm3, %v877_v45, %v874_v52  ;;  %v1039_v11 = vadd.f32 %v871_v61, %v591_v51 }
  0xe3   : > { %v1040_v10 = vadd.f32 %v880_v14, %v592_v48 }
  0xe4   : > { %v1071_v24 = vmul.f32 %v1822_v3, %v1039_v11 }
  0xe5   : > { %v1072_v12 = vmul.f32 %v1824_v37, %v1040_v10 }
  0xe7   : > { %v1096_v55 = vpack.c.bf16 %v1072_v12, %v1071_v24 }
  0xe9   : > { %1530 = vmatpush3.bf16.msra.mxu0 %v1096_v55 }
  0xea   : > { %1540 = vmatprep.subr.bf16.mxu0 (!%p1348_p6), %v1867_v22 }
  0xec   : > { %1347 = vmatmul.mubr.msk.bf16.vlgmr.msra.gmra.mrb[0].mxu0 %vm1346_vm6, %v1866_v44 }
  0xed   : > { %1541 = vmatpush3.bf16.msra.mxu0 (!%p1348_p6), %v1825_v46  ;;  %1544 = vmatprep.mubr.msk.bf16.mxu0 (!%p1348_p6), %vm1868_vm8, %v1867_v22 }
  0xee   : > { %1542 = vmatprep.subr.bf16.mxu0 (!%p1348_p6), %v1867_v22 }
  0xf1   : > { %1543 = vmatpush3.bf16.msra.mxu0 (!%p1348_p6), %v1826_v27 }
 0x1bf   : > { %v1531_v49 = vpop.f32.mrb[0].mxu0 }
 0x1c0   : > { %v1532_v13 = vpop.f32.mrb[1].mxu0 }
 0x1c1   : > { %v1533_v4 = vadd.f32 %v1532_v13, %v1531_v49  ;;  %v1534_v21 = vpop.f32.mrb[2].mxu0  ;;  %1182 = sbr.rel (%p1348_p6) target bundleno = 686 (0x2ae), region = 52 }
 0x1c2   : > { %v1535_v32 = vpop.f32.mrb[3].mxu0 }
 0x1c3   : > { %v1174_v63 = vadd.f32 %v1533_v4, %v1131_v42  ;;  %v1536_v38 = vadd.f32 %v1535_v32, %v1534_v21 }
 0x1c5   : > { %1177 = vst.msk [vmem:[#allocation2] sm:$0xff] %vm1176_vm7, %v1174_v63  ;;  %v1175_v56 = vadd.f32 %v1536_v38, %v1132_v17 }
 0x1c7   : > { %1178 = vst.msk [vmem:[#allocation2 + $0x8] sm:$0xff] %vm1176_vm7, %v1175_v56 }
 0x1cc   : > { %v1185_v30 = vld [vmem:[#allocation2] sm:$0xff] }
 0x1cd   : > { %v1187_v23 = vadd.f32 %v1185_v30, %v1183_v19 }
 0x1ce   : > { %v1186_v25 = vld [vmem:[#allocation2 + $0x8] sm:$0xff] }
 0x1cf   : > { %v1188_v28 = vadd.f32 %v1186_v25, %v1184_v29 }
 0x1d1   : > { %v1189_v20 = vpack.c.bf16 %v1188_v28, %v1187_v23 }
 0x1d3   : > { %1545 = vmatmul.mubr.msk.bf16.vlgmr.msra.gmra.mrb[0].mxu0 %vm1176_vm7, %v1189_v20 }
 0x2a6   : > { %v1250_v34 = vpop.f32.mrb[0].mxu0 }
 0x2a7   : > { %v1251_v58 = vadd.f32 %v1349_v31, %v1250_v34  ;;  %v1546_v36 = vpop.f32.mrb[1].mxu0 }
 0x2a8   : > { %v1253_v44 = vpop.f32.mrb[2].mxu0 }
 0x2a9   : > { %v1257_v60 = vmax.f32 %v1251_v58, 0.0  ;;  %v1254_v39 = vadd.f32 %v1349_v31, %v1253_v44  ;;  %v1547_v40 = vpop.f32.mrb[3].mxu0 }
 0x2ab   : > { %1259 = vst.msk [vmem:[#allocation3] sm:$0xff] %vm1176_vm7, %v1257_v60  ;;  %v1258_v43 = vmax.f32 %v1254_v39, 0.0 }
 0x2ad   : > { %1260 = vst.msk [vmem:[#allocation3 + $0x8] sm:$0xff] %vm1176_vm7, %v1258_v43 }
 0x2ae PF: > { %p1552_p7 = scmp.eq.s32.totalorder %s1913_s22, 2  ;;  %s1869_s25 = smov [#allocation3]  }
 0x2af   : > { %s1267_s26 = sshll.u32 %s1869_s25, 4  ;;  %s1268_s26 = int_to_ptr.vmem [resolvable:$true] %s1267_s26 }
 0x2b0   : > { %s1827_s27 = scalar_lea.vmem %s1268_s26, 256  ;;  %p1834_p11 = scmp.lt.s32.totalorder %s1268_s26, %s1268_s26 }
 0x2b1   : > { %p1828_p8 = scmp.ne.s32.totalorder %s1268_s26, %s1827_s27  ;;  %p1835_p12 = scmp.lt.s32.totalorder %s1827_s27, %s1827_s27 }
 0x2b3   : > { %p1829_p9 = pnand %p1828_p8, %p1552_p7  ;;  %p1836_p13 = por %p1835_p12, %p1834_p11 }
 0x2b5   : > { %p1830_p10 = pneg %p1829_p9 }
 0x2b7   : > { %p1837_p0 = pnand %p1836_p13, %p1830_p10 }
 0x2b9   : > { %1840 = shalt.err (!%p1837_p0)
}
 0x2ba   : > { %s1841_s30 = scalar_lea.hbm %s2460_s6, 256 }
 0x2bb   : > { %p1842_p1 = scmp.ne.s32.totalorder %s2460_s6, %s1841_s30  ;;  %p1847_p4 = scmp.lt.u32.totalorder %s1841_s30, %s2460_s6 }
 0x2bd   : > { %p1843_p2 = pnand %p1842_p1, %p1552_p7 }
 0x2bf   : > { %p1844_p3 = pneg %p1843_p2 }
 0x2c1   : > { %p1849_p5 = pnand %p1847_p4, %p1844_p3 }
 0x2c3   : > { %1852 = shalt.err (!%p1849_p5)
}
 0x2c4   : > { %s1870_s11 = smov 128   ;;  %s1871_s12 = smov 8  }
 0x2c5   : > { %1549 = dma.vmem_to_hbm [thread:$0]  (%p1552_p7), %s1268_s26, 256, %s2460_s6, [#allocation4], %s1870_s11, %s1870_s11, %s1871_s12  }
 0x2c6   : > { %1858 = dma.done.wait (%p1552_p7), [#allocation4], 256  }
 0x2c7   : > { %1860 = vsyncadd (%p1552_p7), [#allocation4], 4294967040 }
 0x2c8 PF: > { %s17_s21 = sadd.s32 1, %s1863_s21  }
 0x2c9   : > { %p14_p6 = scmp.ge.s32.totalorder %s17_s21, 5  }
 0x2cb   :  { %16 = sbr.rel (!%p14_p6) target bundleno = 1 (0x1), region = 85 }
 0x2d2   :  { %1283 = vsyncpa [#allocation4], 1 }
 0x2d3   :  { %1285 = vsyncpa [#allocation4 + $0x1], 1 }

</bundles_post_ra>
